<compile_context>
chip_gen: v7x
topology: tpu7x:2x2x1
jax: 0.10.0
libtpu: 0.0.40
codegen_flags: <defaults>
</compile_context>

<pallas_src>
import functools
import math

import jax
import jax.numpy as jnp
from jax import lax
from jax.experimental import pallas as pl
from jax.experimental.pallas import tpu as pltpu


def _round_up(x: int, m: int) -> int:
    return (x + m - 1) // m * m


# ----------------------------------------------------------------------------
# Pallas kernel: one (F-tile, N-tile, M-tile) grid step = one packed MXU matmul
# ----------------------------------------------------------------------------
def _codec_kernel(bbox_ref,                 # SMEM (4, num_mt) int32 (scalar prefetch)
                  fm_ref, md_ref,           # VMEM inputs (resident or per-M-tile)
                  o_re_ref, o_im_ref,       # VMEM output tiles (resident over k)
                  lhs_ref, rhs_ref,         # VMEM scratch: packed matmul operands
                  *, tile_m, m_resident, matmul_dtype):
    i = pl.program_id(0)          # F-tile
    j = pl.program_id(1)          # N-tile
    k = pl.program_id(2)          # M-tile (reduction axis)

    TF, TN = o_re_ref.shape
    TM = tile_m

    # Zero the (k-resident) output tile at the start of the reduction.
    @pl.when(k == 0)
    def _init():
        o_re_ref[...] = jnp.zeros_like(o_re_ref)
        o_im_ref[...] = jnp.zeros_like(o_im_ref)

    # Band-sparsity skip: hat(x - p) is nonzero only for |x - p| < 1, so this
    # M-tile can only touch lattice rows/cols inside its prefetched bbox.
    f_start = i * TF
    n_start = j * TN
    overlap = ((f_start <= bbox_ref[1, k]) &
               (f_start + (TF - 1) >= bbox_ref[0, k]) &
               (n_start <= bbox_ref[3, k]) &
               (n_start + (TN - 1) >= bbox_ref[2, k]))

    @pl.when(overlap)
    def _compute():
        # Slice the k-th M-tile out of the VMEM-resident centre data.
        if m_resident and fm_ref.shape[1] > TM:
            off = pl.multiple_of(k * TM, TM)        # TM is a multiple of 128 here
            fm_t = fm_ref[:, pl.ds(off, TM)]        # (3, TM)
            md_t = md_ref[pl.ds(off, TM), :]        # (TM, 21) = nm|v_re|v_im
        else:
            fm_t = fm_ref[...]
            md_t = md_ref[...]

        # ---- LHS: hat_f weights, the 3 f-shifts packed along K -> (TF, 3*TM)
        # (int32 iota + convert: universally supported; the convert is cheap.)
        f_idx = (f_start.astype(jnp.float32) +
                 lax.broadcasted_iota(jnp.int32, (TF, TM), 0).astype(jnp.float32))
        for a in range(3):
            wf = jnp.maximum(0.0, 1.0 - jnp.abs(f_idx - fm_t[a:a + 1, :]))
            lhs_ref[:, a * TM:(a + 1) * TM] = wf.astype(matmul_dtype)

        # ---- RHS: per-shift n-profiles (TM, TN); real | imag packed along N.
        n_idx = (n_start.astype(jnp.float32) +
                 lax.broadcasted_iota(jnp.int32, (TM, TN), 1).astype(jnp.float32))
        wn = [jnp.maximum(0.0, 1.0 - jnp.abs(n_idx - md_t[:, b:b + 1]))
              for b in range(3)]                     # n-hats built once, reused
        for a in range(3):
            t_re = md_t[:, 3 + 3 * a:4 + 3 * a] * wn[0]
            t_im = md_t[:, 12 + 3 * a:13 + 3 * a] * wn[0]
            for b in (1, 2):
                c = 3 * a + b
                t_re = t_re + md_t[:, 3 + c:4 + c] * wn[b]
                t_im = t_im + md_t[:, 12 + c:13 + c] * wn[b]
            rhs_ref[a * TM:(a + 1) * TM, 0:TN] = t_re.astype(matmul_dtype)
            rhs_ref[a * TM:(a + 1) * TM, TN:2 * TN] = t_im.astype(matmul_dtype)

        # ---- single packed MXU matmul; accumulate straight into the outputs.
        res = jnp.dot(lhs_ref[...], rhs_ref[...],
                      preferred_element_type=jnp.float32)        # (TF, 2*TN)
        o_re_ref[...] += res[:, 0:TN]
        o_im_ref[...] += res[:, TN:2 * TN]


# ----------------------------------------------------------------------------
# Wrapper: tiling, spatial re-blocking, bounding boxes, residency, pallas_call
# ----------------------------------------------------------------------------
def codec_deposit(fm, nm, v_re, v_im, F, N, *,
                  tile_f=256, tile_n=256, tile_m=256,
                  matmul_dtype=jnp.float32,
                  m_resident_budget_bytes=16 * 1024 * 1024):
    """Dense bilinear deposit of M centres into an (F, N) lattice.

    fm : (3, M)  f deposit positions (one per delta_f shift)
    nm : (M, 3)  n deposit positions (one per delta_n shift)
    v_re, v_im : (M, 9) deposit values, (a, b) flattened as 3*a + b
    Returns (A_re, A_im), each (F, N) float32.
    """
    M = nm.shape[0]

    # ---- tile sizes (lane / sublane aligned; shrink for small problems) -----
    tile_n = max(128, (tile_n // 128) * 128)
    tile_n = min(tile_n, _round_up(N, 128))
    N_pad = _round_up(N, tile_n)

    tile_f = max(8, (tile_f // 8) * 8)
    tile_f = min(tile_f, _round_up(F, 8))
    F_pad = _round_up(F, tile_f)
    # v7x megacore: give the leading "parallel" axis >= 2 tiles when possible.
    if F_pad // tile_f == 1 and tile_f % 16 == 0:
        tile_f //= 2

    if _round_up(M, 8) <= tile_m:
        tile_m = _round_up(M, 8)                  # single M-tile
    else:
        tile_m = max(128, (tile_m // 128) * 128)  # aligned multi-tile
    M_pad = _round_up(M, tile_m)
    num_mt = M_pad // tile_m

    # ---- spatial re-blocking of the centres: sort by (f-band, n-band) so each
    #      M-tile's bounding box is compact in BOTH axes (bbox skip is real). --
    if num_mt > 1:
        kf = jnp.clip(jnp.floor(fm[1, :] / tile_f), 0, F_pad // tile_f)
        kn = jnp.clip(jnp.floor(nm[:, 1] / tile_n), 0, N_pad // tile_n)
        perm = jnp.argsort(kf.astype(jnp.int32) * (N_pad // tile_n + 2)
                           + kn.astype(jnp.int32))
        fm, nm, v_re, v_im = fm[:, perm], nm[perm], v_re[perm], v_im[perm]

    # ---- pad M by replicating the last centre with zero value (no effect) ---
    pad_m = M_pad - M
    if pad_m:
        fm = jnp.pad(fm, ((0, 0), (0, pad_m)), mode="edge")
        nm = jnp.pad(nm, ((0, pad_m), (0, 0)), mode="edge")
        v_re = jnp.pad(v_re, ((0, pad_m), (0, 0)))
        v_im = jnp.pad(v_im, ((0, pad_m), (0, 0)))

    # ---- per-M-tile deposit bounding boxes (scalar prefetch -> SMEM) --------
    f_lo = jnp.floor(jnp.min(fm.reshape(3, num_mt, tile_m), axis=(0, 2)) - 1.0)
    f_hi = jnp.ceil(jnp.max(fm.reshape(3, num_mt, tile_m), axis=(0, 2)) + 1.0)
    n_lo = jnp.floor(jnp.min(nm.reshape(num_mt, tile_m, 3), axis=(1, 2)) - 1.0)
    n_hi = jnp.ceil(jnp.max(nm.reshape(num_mt, tile_m, 3), axis=(1, 2)) + 1.0)
    bbox = jnp.stack([f_lo, f_hi, n_lo, n_hi]).astype(jnp.int32)   # (4, num_mt)

    # ---- consolidate nm | v_re | v_im into one lane-packed (M_pad, 21) array
    mdat = jnp.concatenate([nm, v_re, v_im], axis=1).astype(jnp.float32)
    fm = fm.astype(jnp.float32)

    # ---- VMEM residency of the centre data vs. per-M-tile streaming ---------
    m_bytes = 4 * (fm.size + mdat.size)              # = 96 * M_pad bytes
    m_resident = 2 * m_bytes <= m_resident_budget_bytes   # 2x: pipeline buffers
    if m_resident:
        fm_spec = pl.BlockSpec((3, M_pad), lambda i, j, k, *_: (0, 0))
        md_spec = pl.BlockSpec((M_pad, 21), lambda i, j, k, *_: (0, 0))
    else:
        # TODO(synk): a scalar-prefetched per-(i,j) M-tile list would shrink the
        # k extent further, but the static overlap bound is data dependent, so
        # the dense k loop + bbox skip is kept for the streaming case.
        fm_spec = pl.BlockSpec((3, tile_m), lambda i, j, k, *_: (0, k))
        md_spec = pl.BlockSpec((tile_m, 21), lambda i, j, k, *_: (k, 0))

    # ---- explicit VMEM budget (v7x has only 64 MiB physical) ----------------
    item = jnp.dtype(matmul_dtype).itemsize
    vmem_need = (2 * 2 * tile_f * tile_n * 4                               # out
                 + (tile_f * 3 * tile_m + 3 * tile_m * 2 * tile_n) * item  # scr
                 + (2 * m_bytes if m_resident else 4 * 96 * tile_m)        # in
                 + (8 << 20))                                              # slack
    vmem_limit = int(min(max(vmem_need, 32 << 20), 64 << 20))

    grid = (F_pad // tile_f, N_pad // tile_n, num_mt)
    kernel = functools.partial(_codec_kernel, tile_m=tile_m,
                               m_resident=m_resident, matmul_dtype=matmul_dtype)

    a_re, a_im = pl.pallas_call(
        kernel,
        out_shape=(jax.ShapeDtypeStruct((F_pad, N_pad), jnp.float32),
                   jax.ShapeDtypeStruct((F_pad, N_pad), jnp.float32)),
        grid_spec=pltpu.PrefetchScalarGridSpec(
            num_scalar_prefetch=1,
            grid=grid,
            in_specs=[fm_spec, md_spec],
            out_specs=(pl.BlockSpec((tile_f, tile_n), lambda i, j, k, *_: (i, j)),
                       pl.BlockSpec((tile_f, tile_n), lambda i, j, k, *_: (i, j))),
            scratch_shapes=[
                pltpu.VMEM((tile_f, 3 * tile_m), matmul_dtype),    # packed LHS
                pltpu.VMEM((3 * tile_m, 2 * tile_n), matmul_dtype),  # packed RHS
            ]),
        compiler_params=pltpu.CompilerParams(
            dimension_semantics=("parallel", "parallel", "arbitrary"),
            vmem_limit_bytes=vmem_limit),
    )(bbox, fm, mdat)

    return a_re[:F, :N], a_im[:F, :N]


# ----------------------------------------------------------------------------
# CodecModel: parameter setup + forward (glue in plain JAX, hot path in Pallas)
# ----------------------------------------------------------------------------
class CodecModel:
    """Forward pass only: deposit patterns into the complex lattice A.

    TODO(synk): PatternBank / OccurrenceGrid sources were not provided; they
    get conventional semantics: PatternBank(K) -> (K, 3, 3) real coefficients
    with pattern 0 = all-zero background; OccurrenceGrid holds alpha (M, K)
    logits with select_patterns(tau) = softmax(alpha / tau) and per-centre
    zeta_f, zeta_n, log_rho, theta parameters.
    """

    def __init__(self, F: int, N: int, K: int, key):
        self.F, self.N, self.K = F, N, K
        rows = jnp.arange(0, F, 2, dtype=jnp.float32)
        cols = jnp.arange(0, N, 2, dtype=jnp.float32)
        f_c, n_c = jnp.meshgrid(rows, cols, indexing="ij")
        self.f_centres = f_c.reshape(-1)          # (M,)
        self.n_centres = n_c.reshape(-1)          # (M,)
        self.M = self.f_centres.shape[0]

        k = jax.random.split(key, 6)
        P = 0.5 * jax.random.normal(k[0], (K, 3, 3), jnp.float32)
        self.P = P.at[0].set(0.0)                 # background pattern
        self.alpha = jax.random.normal(k[1], (self.M, K), jnp.float32)
        self.zeta_f = 0.5 * jax.random.normal(k[2], (self.M,), jnp.float32)
        self.zeta_n = 0.5 * jax.random.normal(k[3], (self.M,), jnp.float32)
        self.log_rho = 0.1 * jax.random.normal(k[4], (self.M,), jnp.float32)
        self.theta = jax.random.uniform(k[5], (self.M,), jnp.float32,
                                        minval=-math.pi, maxval=math.pi)

    def _prep(self, tau: float):
        """Plain-JAX glue: pattern selection, amplitudes, deposit positions."""
        # NOTE: argmax(softmax(x / tau)) == argmax(x); the softmax is kept only
        # to mirror the original select_patterns(tau) -> argmax flow.
        sel = jax.nn.softmax(self.alpha / tau, axis=-1)          # (M, K)
        k_idx = jnp.argmax(sel, axis=-1)                         # (M,)
        P_sel = self.P[k_idx]                                    # (M, 3, 3)

        df = (2.0 / (2.0 * math.pi)) * self.zeta_f               # (M,)
        dn = (2.0 / (2.0 * math.pi)) * self.zeta_n               # (M,)
        rho = jnp.exp(self.log_rho)
        amp_re = rho * jnp.cos(self.theta)
        amp_im = rho * jnp.sin(self.theta)

        shifts = jnp.arange(3, dtype=jnp.float32) - 1.0          # delta in {-1,0,1}
        fm = shifts[:, None] + (self.f_centres + df)[None, :]    # (3, M)
        nm = (self.n_centres + dn)[:, None] + shifts[None, :]    # (M, 3)
        v_re = (amp_re[:, None, None] * P_sel).reshape(self.M, 9)
        v_im = (amp_im[:, None, None] * P_sel).reshape(self.M, 9)
        return fm, nm, v_re, v_im

    def forward(self, tau: float = 0.3, *, matmul_dtype=jnp.float32):
        # matmul_dtype=jnp.bfloat16 -> full-rate MXU on v6e/v7x (f32 accum);
        # the default f32 path uses the accurate multi-pass MXU mode.
        fm, nm, v_re, v_im = self._prep(tau)
        a_re, a_im = codec_deposit(fm, nm, v_re, v_im, self.F, self.N,
                                   matmul_dtype=matmul_dtype)
        return a_re + 1j * a_im                                  # (F, N) complex64

    def forward_reference(self, tau: float = 0.3):
        """Pure-JAX reference implementing the original bilinear_deposit scatter."""
        fm, nm, v_re, v_im = self._prep(tau)
        F, N = self.F, self.N
        val = (v_re + 1j * v_im).astype(jnp.complex64)           # (M, 9)
        A = jnp.zeros((F, N), jnp.complex64)
        for a in range(3):
            for b in range(3):
                f_hat = fm[a, :]
                n_hat = nm[:, b]
                v = val[:, 3 * a + b]
                f0 = jnp.floor(f_hat)
                n0 = jnp.floor(n_hat)
                wf = f_hat - f0
                wn = n_hat - n0
                for fi, fw in ((f0, 1.0 - wf), (f0 + 1.0, wf)):
                    for ni, nw in ((n0, 1.0 - wn), (n0 + 1.0, wn)):
                        idx_f = fi.astype(jnp.int32)
                        idx_n = ni.astype(jnp.int32)
                        valid = ((idx_f >= 0) & (idx_f < F) &
                                 (idx_n >= 0) & (idx_n < N))
                        w = jnp.where(valid, fw * nw, 0.0).astype(jnp.complex64)
                        A = A.at[jnp.clip(idx_f, 0, F - 1),
                                 jnp.clip(idx_n, 0, N - 1)].add(v * w)
        return A


if __name__ == "__main__":
    tau = 0.3

    # Primary small case (single M-tile, two F-tiles, padded N).
    model = CodecModel(16, 16, 4, jax.random.PRNGKey(0))
    A = jax.block_until_ready(model.forward(tau))
    A_ref = jax.block_until_ready(model.forward_reference(tau))
    assert A.shape == (16, 16) and A.dtype == jnp.complex64
    assert jnp.allclose(A, A_ref, rtol=2e-3, atol=2e-3), "mismatch vs reference (16x16)"

    # Secondary case: multiple M-tiles (reduction-axis accumulation, bbox skip,
    # spatial re-blocking) plus a non-multiple-of-8 F tile and N padding.
    model2 = CodecModel(40, 40, 5, jax.random.PRNGKey(1))
    A2 = jax.block_until_ready(model2.forward(tau))
    A2_ref = jax.block_until_ready(model2.forward_reference(tau))
    assert A2.shape == (40, 40) and A2.dtype == jnp.complex64
    assert jnp.allclose(A2, A2_ref, rtol=2e-3, atol=2e-3), "mismatch vs reference (40x40)"

    # bf16 MXU-operand path (full rate on v6e/v7x); looser tolerance.
    A2_bf = jax.block_until_ready(model2.forward(tau, matmul_dtype=jnp.bfloat16))
    assert float(jnp.max(jnp.abs(A2_bf - A2_ref))) < 0.25, "bf16 path drifted"

    print("KERNEL_OK")
</pallas_src>

<mosaic_0001>
module attributes {stable_mosaic.version = 11 : i64} {
  func.func @_codec_kernel(%arg0: i32, %arg1: i32, %arg2: i32, %arg3: memref<4x1xi32, #tpu.memory_space<smem>>, %arg4: memref<3x64xf32, #tpu.memory_space<vmem>>, %arg5: memref<64x21xf32, #tpu.memory_space<vmem>>, %arg6: memref<8x128xf32, #tpu.memory_space<vmem>>, %arg7: memref<8x128xf32, #tpu.memory_space<vmem>>, %arg8: memref<8x192xf32, #tpu.memory_space<vmem>>, %arg9: memref<192x256xf32, #tpu.memory_space<vmem>>) attributes {dimension_semantics = [#tpu.dimension_semantics<parallel>, #tpu.dimension_semantics<parallel>, #tpu.dimension_semantics<arbitrary>], iteration_bounds = array<i64: 2, 1, 1>, scalar_prefetch = 1 : i64, scratch_operands = 2 : i64, tpu.core_type = #tpu.core_type<tc>, window_params = [{pipeline_mode = #tpu.pipeline_mode<synchronous>, transform_indices = @transform_0, window_bounds = array<i64: 3, 64>}, {pipeline_mode = #tpu.pipeline_mode<synchronous>, transform_indices = @transform_1, window_bounds = array<i64: 64, 21>}, {transform_indices = @transform_2, window_bounds = array<i64: 8, 128>}, {transform_indices = @transform_3, window_bounds = array<i64: 8, 128>}]} {
    %c0_i32 = arith.constant 0 : i32
    %0 = arith.cmpi eq, %arg2, %c0_i32 : i32
    %1 = arith.extui %0 : i1 to i32
    %c0_i32_0 = arith.constant 0 : i32
    %2 = arith.cmpi ne, %1, %c0_i32_0 : i32
    scf.if %2 {
      %cst = arith.constant 0.000000e+00 : f32
      %24 = vector.broadcast %cst : f32 to vector<8x128xf32>
      %c0_2 = arith.constant 0 : index
      %c0_3 = arith.constant 0 : index
      %25 = vector.load %arg6[%c0_2, %c0_3] : memref<8x128xf32, #tpu.memory_space<vmem>>, vector<8x128xf32>
      tpu.vector_store %arg6[%c0_2, %c0_3], %24 {strides = array<i32>} : memref<8x128xf32, #tpu.memory_space<vmem>>, vector<8x128xf32>,
      %cst_4 = arith.constant 0.000000e+00 : f32
      %26 = vector.broadcast %cst_4 : f32 to vector<8x128xf32>
      %c0_5 = arith.constant 0 : index
      %c0_6 = arith.constant 0 : index
      %27 = vector.load %arg7[%c0_5, %c0_6] : memref<8x128xf32, #tpu.memory_space<vmem>>, vector<8x128xf32>
      tpu.vector_store %arg7[%c0_5, %c0_6], %26 {strides = array<i32>} : memref<8x128xf32, #tpu.memory_space<vmem>>, vector<8x128xf32>,
    } else {
    }
    %c8_i32 = arith.constant 8 : i32
    %3 = arith.muli %arg0, %c8_i32 : i32
    %c128_i32 = arith.constant 128 : i32
    %4 = arith.muli %arg1, %c128_i32 : i32
    %c1 = arith.constant 1 : index
    %5 = arith.index_cast %arg2 : i32 to index
    %6 = memref.load %arg3[%c1, %5] : memref<4x1xi32, #tpu.memory_space<smem>>
    %7 = arith.cmpi sle, %3, %6 : i32
    %c7_i32 = arith.constant 7 : i32
    %8 = arith.addi %3, %c7_i32 : i32
    %c0 = arith.constant 0 : index
    %9 = arith.index_cast %arg2 : i32 to index
    %10 = memref.load %arg3[%c0, %9] : memref<4x1xi32, #tpu.memory_space<smem>>
    %11 = arith.cmpi sge, %8, %10 : i32
    %12 = arith.andi %7, %11 : i1
    %c3 = arith.constant 3 : index
    %13 = arith.index_cast %arg2 : i32 to index
    %14 = memref.load %arg3[%c3, %13] : memref<4x1xi32, #tpu.memory_space<smem>>
    %15 = arith.cmpi sle, %4, %14 : i32
    %16 = arith.andi %12, %15 : i1
    %c127_i32 = arith.constant 127 : i32
    %17 = arith.addi %4, %c127_i32 : i32
    %c2 = arith.constant 2 : index
    %18 = arith.index_cast %arg2 : i32 to index
    %19 = memref.load %arg3[%c2, %18] : memref<4x1xi32, #tpu.memory_space<smem>>
    %20 = arith.cmpi sge, %17, %19 : i32
    %21 = arith.andi %16, %20 : i1
    %22 = arith.extui %21 : i1 to i32
    %c0_i32_1 = arith.constant 0 : i32
    %23 = arith.cmpi ne, %22, %c0_i32_1 : i32
    scf.if %23 {
      %c0_2 = arith.constant 0 : index
      %c0_3 = arith.constant 0 : index
      %24 = vector.load %arg4[%c0_2, %c0_3] : memref<3x64xf32, #tpu.memory_space<vmem>>, vector<3x64xf32>
      %c0_4 = arith.constant 0 : index
      %c0_5 = arith.constant 0 : index
      %25 = vector.load %arg5[%c0_4, %c0_5] : memref<64x21xf32, #tpu.memory_space<vmem>>, vector<64x21xf32>
      %26 = arith.sitofp %3 : i32 to f32
      %27 = tpu.iota {dimensions = array<i32: 0>} : vector<8x64xi32>
      %28 = arith.sitofp %27 : vector<8x64xi32> to vector<8x64xf32>
      %29 = vector.broadcast %26 : f32 to vector<8x64xf32>
      %30 = arith.addf %29, %28 : vector<8x64xf32>
      %31 = vector.extract_strided_slice %24 {offsets = [0, 0], sizes = [1, 64], strides = [1, 1]} : vector<3x64xf32> to vector<1x64xf32>
      %32 = vector.broadcast %31 : vector<1x64xf32> to vector<8x64xf32>
      %33 = arith.subf %30, %32 : vector<8x64xf32>
      %34 = math.absf %33 : vector<8x64xf32>
      %cst = arith.constant 1.000000e+00 : f32
      %35 = vector.broadcast %cst : f32 to vector<8x64xf32>
      %36 = arith.subf %35, %34 : vector<8x64xf32>
      %cst_6 = arith.constant 0.000000e+00 : f32
      %37 = vector.broadcast %cst_6 : f32 to vector<8x64xf32>
      %38 = arith.maximumf %37, %36 : vector<8x64xf32>
      %c0_7 = arith.constant 0 : index
      %c0_8 = arith.constant 0 : index
      %39 = vector.load %arg8[%c0_7, %c0_8] : memref<8x192xf32, #tpu.memory_space<vmem>>, vector<8x64xf32>
      tpu.vector_store %arg8[%c0_7, %c0_8], %38 {strides = array<i32>} : memref<8x192xf32, #tpu.memory_space<vmem>>, vector<8x64xf32>,
      %40 = vector.extract_strided_slice %24 {offsets = [1, 0], sizes = [1, 64], strides = [1, 1]} : vector<3x64xf32> to vector<1x64xf32>
      %41 = vector.broadcast %40 : vector<1x64xf32> to vector<8x64xf32>
      %42 = arith.subf %30, %41 : vector<8x64xf32>
      %43 = math.absf %42 : vector<8x64xf32>
      %cst_9 = arith.constant 1.000000e+00 : f32
      %44 = vector.broadcast %cst_9 : f32 to vector<8x64xf32>
      %45 = arith.subf %44, %43 : vector<8x64xf32>
      %cst_10 = arith.constant 0.000000e+00 : f32
      %46 = vector.broadcast %cst_10 : f32 to vector<8x64xf32>
      %47 = arith.maximumf %46, %45 : vector<8x64xf32>
      %c0_11 = arith.constant 0 : index
      %c64 = arith.constant 64 : index
      %48 = vector.load %arg8[%c0_11, %c64] : memref<8x192xf32, #tpu.memory_space<vmem>>, vector<8x64xf32>
      tpu.vector_store %arg8[%c0_11, %c64], %47 {strides = array<i32>} : memref<8x192xf32, #tpu.memory_space<vmem>>, vector<8x64xf32>,
      %49 = vector.extract_strided_slice %24 {offsets = [2, 0], sizes = [1, 64], strides = [1, 1]} : vector<3x64xf32> to vector<1x64xf32>
      %50 = vector.broadcast %49 : vector<1x64xf32> to vector<8x64xf32>
      %51 = arith.subf %30, %50 : vector<8x64xf32>
      %52 = math.absf %51 : vector<8x64xf32>
      %cst_12 = arith.constant 1.000000e+00 : f32
      %53 = vector.broadcast %cst_12 : f32 to vector<8x64xf32>
      %54 = arith.subf %53, %52 : vector<8x64xf32>
      %cst_13 = arith.constant 0.000000e+00 : f32
      %55 = vector.broadcast %cst_13 : f32 to vector<8x64xf32>
      %56 = arith.maximumf %55, %54 : vector<8x64xf32>
      %c0_14 = arith.constant 0 : index
      %c128 = arith.constant 128 : index
      %57 = vector.load %arg8[%c0_14, %c128] : memref<8x192xf32, #tpu.memory_space<vmem>>, vector<8x64xf32>
      tpu.vector_store %arg8[%c0_14, %c128], %56 {strides = array<i32>} : memref<8x192xf32, #tpu.memory_space<vmem>>, vector<8x64xf32>,
      %58 = arith.sitofp %4 : i32 to f32
      %59 = tpu.iota {dimensions = array<i32: 1>} : vector<64x128xi32>
      %60 = arith.sitofp %59 : vector<64x128xi32> to vector<64x128xf32>
      %61 = vector.broadcast %58 : f32 to vector<64x128xf32>
      %62 = arith.addf %61, %60 : vector<64x128xf32>
      %63 = vector.extract_strided_slice %25 {offsets = [0, 0], sizes = [64, 1], strides = [1, 1]} : vector<64x21xf32> to vector<64x1xf32>
      %64 = vector.broadcast %63 : vector<64x1xf32> to vector<64x128xf32>
      %65 = arith.subf %62, %64 : vector<64x128xf32>
      %66 = math.absf %65 : vector<64x128xf32>
      %cst_15 = arith.constant 1.000000e+00 : f32
      %67 = vector.broadcast %cst_15 : f32 to vector<64x128xf32>
      %68 = arith.subf %67, %66 : vector<64x128xf32>
      %cst_16 = arith.constant 0.000000e+00 : f32
      %69 = vector.broadcast %cst_16 : f32 to vector<64x128xf32>
      %70 = arith.maximumf %69, %68 : vector<64x128xf32>
      %71 = vector.extract_strided_slice %25 {offsets = [0, 1], sizes = [64, 1], strides = [1, 1]} : vector<64x21xf32> to vector<64x1xf32>
      %72 = vector.broadcast %71 : vector<64x1xf32> to vector<64x128xf32>
      %73 = arith.subf %62, %72 : vector<64x128xf32>
      %74 = math.absf %73 : vector<64x128xf32>
      %cst_17 = arith.constant 1.000000e+00 : f32
      %75 = vector.broadcast %cst_17 : f32 to vector<64x128xf32>
      %76 = arith.subf %75, %74 : vector<64x128xf32>
      %cst_18 = arith.constant 0.000000e+00 : f32
      %77 = vector.broadcast %cst_18 : f32 to vector<64x128xf32>
      %78 = arith.maximumf %77, %76 : vector<64x128xf32>
      %79 = vector.extract_strided_slice %25 {offsets = [0, 2], sizes = [64, 1], strides = [1, 1]} : vector<64x21xf32> to vector<64x1xf32>
      %80 = vector.broadcast %79 : vector<64x1xf32> to vector<64x128xf32>
      %81 = arith.subf %62, %80 : vector<64x128xf32>
      %82 = math.absf %81 : vector<64x128xf32>
      %cst_19 = arith.constant 1.000000e+00 : f32
      %83 = vector.broadcast %cst_19 : f32 to vector<64x128xf32>
      %84 = arith.subf %83, %82 : vector<64x128xf32>
      %cst_20 = arith.constant 0.000000e+00 : f32
      %85 = vector.broadcast %cst_20 : f32 to vector<64x128xf32>
      %86 = arith.maximumf %85, %84 : vector<64x128xf32>
      %87 = vector.extract_strided_slice %25 {offsets = [0, 3], sizes = [64, 1], strides = [1, 1]} : vector<64x21xf32> to vector<64x1xf32>
      %88 = vector.broadcast %87 : vector<64x1xf32> to vector<64x128xf32>
      %89 = arith.mulf %88, %70 : vector<64x128xf32>
      %90 = vector.extract_strided_slice %25 {offsets = [0, 12], sizes = [64, 1], strides = [1, 1]} : vector<64x21xf32> to vector<64x1xf32>
      %91 = vector.broadcast %90 : vector<64x1xf32> to vector<64x128xf32>
      %92 = arith.mulf %91, %70 : vector<64x128xf32>
      %93 = vector.extract_strided_slice %25 {offsets = [0, 4], sizes = [64, 1], strides = [1, 1]} : vector<64x21xf32> to vector<64x1xf32>
      %94 = vector.broadcast %93 : vector<64x1xf32> to vector<64x128xf32>
      %95 = arith.mulf %94, %78 : vector<64x128xf32>
      %96 = arith.addf %89, %95 : vector<64x128xf32>
      %97 = vector.extract_strided_slice %25 {offsets = [0, 13], sizes = [64, 1], strides = [1, 1]} : vector<64x21xf32> to vector<64x1xf32>
      %98 = vector.broadcast %97 : vector<64x1xf32> to vector<64x128xf32>
      %99 = arith.mulf %98, %78 : vector<64x128xf32>
      %100 = arith.addf %92, %99 : vector<64x128xf32>
      %101 = vector.extract_strided_slice %25 {offsets = [0, 5], sizes = [64, 1], strides = [1, 1]} : vector<64x21xf32> to vector<64x1xf32>
      %102 = vector.broadcast %101 : vector<64x1xf32> to vector<64x128xf32>
      %103 = arith.mulf %102, %86 : vector<64x128xf32>
      %104 = arith.addf %96, %103 : vector<64x128xf32>
      %105 = vector.extract_strided_slice %25 {offsets = [0, 14], sizes = [64, 1], strides = [1, 1]} : vector<64x21xf32> to vector<64x1xf32>
      %106 = vector.broadcast %105 : vector<64x1xf32> to vector<64x128xf32>
      %107 = arith.mulf %106, %86 : vector<64x128xf32>
      %108 = arith.addf %100, %107 : vector<64x128xf32>
      %c0_21 = arith.constant 0 : index
      %c0_22 = arith.constant 0 : index
      %109 = vector.load %arg9[%c0_21, %c0_22] : memref<192x256xf32, #tpu.memory_space<vmem>>, vector<64x128xf32>
      tpu.vector_store %arg9[%c0_21, %c0_22], %104 {strides = array<i32>} : memref<192x256xf32, #tpu.memory_space<vmem>>, vector<64x128xf32>,
      %c0_23 = arith.constant 0 : index
      %c128_24 = arith.constant 128 : index
      %110 = vector.load %arg9[%c0_23, %c128_24] : memref<192x256xf32, #tpu.memory_space<vmem>>, vector<64x128xf32>
      tpu.vector_store %arg9[%c0_23, %c128_24], %108 {strides = array<i32>} : memref<192x256xf32, #tpu.memory_space<vmem>>, vector<64x128xf32>,
      %111 = vector.extract_strided_slice %25 {offsets = [0, 6], sizes = [64, 1], strides = [1, 1]} : vector<64x21xf32> to vector<64x1xf32>
      %112 = vector.broadcast %111 : vector<64x1xf32> to vector<64x128xf32>
      %113 = arith.mulf %112, %70 : vector<64x128xf32>
      %114 = vector.extract_strided_slice %25 {offsets = [0, 15], sizes = [64, 1], strides = [1, 1]} : vector<64x21xf32> to vector<64x1xf32>
      %115 = vector.broadcast %114 : vector<64x1xf32> to vector<64x128xf32>
      %116 = arith.mulf %115, %70 : vector<64x128xf32>
      %117 = vector.extract_strided_slice %25 {offsets = [0, 7], sizes = [64, 1], strides = [1, 1]} : vector<64x21xf32> to vector<64x1xf32>
      %118 = vector.broadcast %117 : vector<64x1xf32> to vector<64x128xf32>
      %119 = arith.mulf %118, %78 : vector<64x128xf32>
      %120 = arith.addf %113, %119 : vector<64x128xf32>
      %121 = vector.extract_strided_slice %25 {offsets = [0, 16], sizes = [64, 1], strides = [1, 1]} : vector<64x21xf32> to vector<64x1xf32>
      %122 = vector.broadcast %121 : vector<64x1xf32> to vector<64x128xf32>
      %123 = arith.mulf %122, %78 : vector<64x128xf32>
      %124 = arith.addf %116, %123 : vector<64x128xf32>
      %125 = vector.extract_strided_slice %25 {offsets = [0, 8], sizes = [64, 1], strides = [1, 1]} : vector<64x21xf32> to vector<64x1xf32>
      %126 = vector.broadcast %125 : vector<64x1xf32> to vector<64x128xf32>
      %127 = arith.mulf %126, %86 : vector<64x128xf32>
      %128 = arith.addf %120, %127 : vector<64x128xf32>
      %129 = vector.extract_strided_slice %25 {offsets = [0, 17], sizes = [64, 1], strides = [1, 1]} : vector<64x21xf32> to vector<64x1xf32>
      %130 = vector.broadcast %129 : vector<64x1xf32> to vector<64x128xf32>
      %131 = arith.mulf %130, %86 : vector<64x128xf32>
      %132 = arith.addf %124, %131 : vector<64x128xf32>
      %c64_25 = arith.constant 64 : index
      %c0_26 = arith.constant 0 : index
      %133 = vector.load %arg9[%c64_25, %c0_26] : memref<192x256xf32, #tpu.memory_space<vmem>>, vector<64x128xf32>
      tpu.vector_store %arg9[%c64_25, %c0_26], %128 {strides = array<i32>} : memref<192x256xf32, #tpu.memory_space<vmem>>, vector<64x128xf32>,
      %c64_27 = arith.constant 64 : index
      %c128_28 = arith.constant 128 : index
      %134 = vector.load %arg9[%c64_27, %c128_28] : memref<192x256xf32, #tpu.memory_space<vmem>>, vector<64x128xf32>
      tpu.vector_store %arg9[%c64_27, %c128_28], %132 {strides = array<i32>} : memref<192x256xf32, #tpu.memory_space<vmem>>, vector<64x128xf32>,
      %135 = vector.extract_strided_slice %25 {offsets = [0, 9], sizes = [64, 1], strides = [1, 1]} : vector<64x21xf32> to vector<64x1xf32>
      %136 = vector.broadcast %135 : vector<64x1xf32> to vector<64x128xf32>
      %137 = arith.mulf %136, %70 : vector<64x128xf32>
      %138 = vector.extract_strided_slice %25 {offsets = [0, 18], sizes = [64, 1], strides = [1, 1]} : vector<64x21xf32> to vector<64x1xf32>
      %139 = vector.broadcast %138 : vector<64x1xf32> to vector<64x128xf32>
      %140 = arith.mulf %139, %70 : vector<64x128xf32>
      %141 = vector.extract_strided_slice %25 {offsets = [0, 10], sizes = [64, 1], strides = [1, 1]} : vector<64x21xf32> to vector<64x1xf32>
      %142 = vector.broadcast %141 : vector<64x1xf32> to vector<64x128xf32>
      %143 = arith.mulf %142, %78 : vector<64x128xf32>
      %144 = arith.addf %137, %143 : vector<64x128xf32>
      %145 = vector.extract_strided_slice %25 {offsets = [0, 19], sizes = [64, 1], strides = [1, 1]} : vector<64x21xf32> to vector<64x1xf32>
      %146 = vector.broadcast %145 : vector<64x1xf32> to vector<64x128xf32>
      %147 = arith.mulf %146, %78 : vector<64x128xf32>
      %148 = arith.addf %140, %147 : vector<64x128xf32>
      %149 = vector.extract_strided_slice %25 {offsets = [0, 11], sizes = [64, 1], strides = [1, 1]} : vector<64x21xf32> to vector<64x1xf32>
      %150 = vector.broadcast %149 : vector<64x1xf32> to vector<64x128xf32>
      %151 = arith.mulf %150, %86 : vector<64x128xf32>
      %152 = arith.addf %144, %151 : vector<64x128xf32>
      %153 = vector.extract_strided_slice %25 {offsets = [0, 20], sizes = [64, 1], strides = [1, 1]} : vector<64x21xf32> to vector<64x1xf32>
      %154 = vector.broadcast %153 : vector<64x1xf32> to vector<64x128xf32>
      %155 = arith.mulf %154, %86 : vector<64x128xf32>
      %156 = arith.addf %148, %155 : vector<64x128xf32>
      %c128_29 = arith.constant 128 : index
      %c0_30 = arith.constant 0 : index
      %157 = vector.load %arg9[%c128_29, %c0_30] : memref<192x256xf32, #tpu.memory_space<vmem>>, vector<64x128xf32>
      tpu.vector_store %arg9[%c128_29, %c0_30], %152 {strides = array<i32>} : memref<192x256xf32, #tpu.memory_space<vmem>>, vector<64x128xf32>,
      %c128_31 = arith.constant 128 : index
      %c128_32 = arith.constant 128 : index
      %158 = vector.load %arg9[%c128_31, %c128_32] : memref<192x256xf32, #tpu.memory_space<vmem>>, vector<64x128xf32>
      tpu.vector_store %arg9[%c128_31, %c128_32], %156 {strides = array<i32>} : memref<192x256xf32, #tpu.memory_space<vmem>>, vector<64x128xf32>,
      %c0_33 = arith.constant 0 : index
      %c0_34 = arith.constant 0 : index
      %159 = vector.load %arg8[%c0_33, %c0_34] : memref<8x192xf32, #tpu.memory_space<vmem>>, vector<8x192xf32>
      %c0_35 = arith.constant 0 : index
      %c0_36 = arith.constant 0 : index
      %160 = vector.load %arg9[%c0_35, %c0_36] : memref<192x256xf32, #tpu.memory_space<vmem>>, vector<192x256xf32>
      %cst_37 = arith.constant dense<0.000000e+00> : vector<8x256xf32>
      %161 = tpu.matmul %159, %160, %cst_37 {dimension_numbers = #tpu.dot_dimension_numbers<[1], [0], [0], [1], [0, 0, 1, 1], [], []>} : vector<8x192xf32>, vector<192x256xf32>, vector<8x256xf32> -> vector<8x256xf32>
      %c0_38 = arith.constant 0 : index
      %c0_39 = arith.constant 0 : index
      %162 = vector.load %arg6[%c0_38, %c0_39] : memref<8x128xf32, #tpu.memory_space<vmem>>, vector<8x128xf32>
      %163 = vector.extract_strided_slice %161 {offsets = [0, 0], sizes = [8, 128], strides = [1, 1]} : vector<8x256xf32> to vector<8x128xf32>
      %164 = arith.addf %162, %163 : vector<8x128xf32>
      %c0_40 = arith.constant 0 : index
      %c0_41 = arith.constant 0 : index
      %165 = vector.load %arg6[%c0_40, %c0_41] : memref<8x128xf32, #tpu.memory_space<vmem>>, vector<8x128xf32>
      tpu.vector_store %arg6[%c0_40, %c0_41], %164 {strides = array<i32>} : memref<8x128xf32, #tpu.memory_space<vmem>>, vector<8x128xf32>,
      %c0_42 = arith.constant 0 : index
      %c0_43 = arith.constant 0 : index
      %166 = vector.load %arg7[%c0_42, %c0_43] : memref<8x128xf32, #tpu.memory_space<vmem>>, vector<8x128xf32>
      %167 = vector.extract_strided_slice %161 {offsets = [0, 128], sizes = [8, 128], strides = [1, 1]} : vector<8x256xf32> to vector<8x128xf32>
      %168 = arith.addf %166, %167 : vector<8x128xf32>
      %c0_44 = arith.constant 0 : index
      %c0_45 = arith.constant 0 : index
      %169 = vector.load %arg7[%c0_44, %c0_45] : memref<8x128xf32, #tpu.memory_space<vmem>>, vector<8x128xf32>
      tpu.vector_store %arg7[%c0_44, %c0_45], %168 {strides = array<i32>} : memref<8x128xf32, #tpu.memory_space<vmem>>, vector<8x128xf32>,
    } else {
    }
    return
  }
  func.func @transform_0(%arg0: i32, %arg1: i32, %arg2: i32, %arg3: memref<4x1xi32, #tpu.memory_space<smem>>) -> (i32, i32) {
    %c0_i32 = arith.constant 0 : i32
    %c0_i32_0 = arith.constant 0 : i32
    %c0_i32_1 = arith.constant 0 : i32
    return %c0_i32, %c0_i32_0 : i32, i32
  }
  func.func @transform_1(%arg0: i32, %arg1: i32, %arg2: i32, %arg3: memref<4x1xi32, #tpu.memory_space<smem>>) -> (i32, i32) {
    %c0_i32 = arith.constant 0 : i32
    %c0_i32_0 = arith.constant 0 : i32
    %c0_i32_1 = arith.constant 0 : i32
    return %c0_i32, %c0_i32_0 : i32, i32
  }
  func.func @transform_2(%arg0: i32, %arg1: i32, %arg2: i32, %arg3: memref<4x1xi32, #tpu.memory_space<smem>>) -> (i32, i32) {
    %c0_i32 = arith.constant 0 : i32
    return %arg0, %arg1 : i32, i32
  }
  func.func @transform_3(%arg0: i32, %arg1: i32, %arg2: i32, %arg3: memref<4x1xi32, #tpu.memory_space<smem>>) -> (i32, i32) {
    %c0_i32 = arith.constant 0 : i32
    return %arg0, %arg1 : i32, i32
  }
}

</mosaic_0001>

<bundles_post_ra>
// kernel: tpu_custom_call.1
= control target key start
LH: loop header
LB: loop body
LE: loop exit
PB: predicated region body
PF: predicated region fallthrough
CT: control target
= control target key end

     0   :  { %s2930_s0 = inlined_call_operand.vmem [shape: s32[4,1], index: 0, kind: input, shape index: {}]   ;;  %s2931_s1 = inlined_call_operand.vmem [shape: f32[3,64], index: 1, kind: input, shape index: {}]   ;;  %s2932_s2 = inlined_call_operand.vmem [shape: f32[64,21], index: 2, kind: input, shape index: {}]   ;;  %s2933_s3 = inlined_call_operand.hbm [shape: f32[16,128], index: 3, kind: output, shape index: {0}]   ;;  %s2934_s4 = inlined_call_operand.hbm [shape: f32[16,128], index: 4, kind: output, shape index: {1}]  }
   0x1   :  { %s10_s17 = sshll.u32 %s2930_s0, 4  ;;  %s11_s17 = int_to_ptr.vmem [resolvable:$true] %s10_s17 }
   0x2   :  { %s1833_s18 = scalar_lea.vmem %s11_s17, 64  ;;  %p1838_p1 = scmp.lt.s32.totalorder %s11_s17, %s11_s17 }
   0x3   :  { %p1834_p0 = scmp.ne.s32.totalorder %s11_s17, %s1833_s18  ;;  %p1839_p2 = scmp.lt.s32.totalorder %s1833_s18, %s1833_s18 }
   0x5   :  { %p1840_p3 = por %p1839_p2, %p1838_p1 }
   0x7   :  { %p1841_p4 = pnand %p1840_p3, %p1834_p0 }
   0x9   :  { %1844 = shalt.err (!%p1841_p4)  }
   0xa   :  { %s1959_s19 = smov [#allocation5]  }
   0xb   :  { %13 = dma.vmem_to_smem %s11_s17, 64, %s1959_s19, [#allocation4] }
   0xc   :  { %1925 = dma.done.wait [#allocation4], 64 }
   0xd   :  { %1926 = vsyncadd [#allocation4], 4294967232 }
   0xe   :  { %15 = sfence }
   0xf   :  { %16 = vsyncpa [#allocation7], 0 }
  0x10   :  { %18 = vsyncpa [#allocation7 + $0x1], 0 }
  0x11   :  { %19 = vsyncpa [#allocation9], 0 }
  0x12   :  { %21 = vsyncpa [#allocation9 + $0x1], 0  ;;  %s2013_s20 = smov 0   ;;  %s2015_s0 = smov 0  }
  0x13   :  { %s2017_s21 = smov 0   ;;  %s2019_s22 = smov 0  }
  0x14   :  { %s2021_s23 = smov 0   ;;  %s2023_s24 = smov 0  }
  0x15 LB: > { %s1603_s25 = sadd.s32 4294967295, %s1957_s24   ;;  %s1604_s26 = sadd.s32 4294967294, %s1957_s24   ;;  %s1957_s24 = sphi %s2023_s24, %s27_s24   ;;  %s1953_s23 = sphi %s2021_s23, %s3037_s23   ;;  %s1949_s22 = sphi %s2019_s22, %s3036_s22   ;;  %s1945_s21 = sphi %s2017_s21, %s3035_s21   ;;  %s1941_s0 = sphi %s2015_s0, %s3034_s0   ;;  %s1937_s20 = sphi %s2013_s20, %s3033_s20  }
  0x16   : > { %s46_s27 = sadd.s32 1, %s1953_s23  ;;  %s97_s28 = sadd.s32 1, %s1945_s21 }
  0x17   : > { %p48_p5 = scmp.ge.s32.totalorder %s46_s27, 2  ;;  %p107_p6 = scmp.ne.s32.totalorder %s1945_s21, %s1941_s0 }
  0x18   : > { %p108_p7 = scmp.eq.s32.totalorder %s1603_s25, 1  ;;  %p113_p8 = scmp.ne.s32.totalorder %s1941_s0, %s1937_s20 }
  0x19   : > { %s3039_s27 = smov (%p48_p5, %s46_s27), 0  ;;  %p114_p10 = scmp.eq.s32.totalorder %s1604_s26, 1 }
  0x1a   : > { %p2053_p9 = por %p108_p7, %p107_p6  ;;  %s92_s30 = ssub.s32 %s1953_s23, %s3039_s27 }
  0x1b   : > { %p1606_p11 = scmp.ge.s32.totalorder %s1957_s24, 1  ;;  %p95_p12 = scmp.eq.s32.totalorder %s92_s30, 0 }
  0x1c   : > { %p2060_p13 = por %p114_p10, %p113_p8  ;;  %p166_p0 = scmp.lt.s32.totalorder %s1957_s24, 3 }
  0x1d   : > { %s2066_s6 = scalar_select %p95_p12, %s1945_s21, %s97_s28  }
  0x1e   : > { %p167_p1 = pnand %p1606_p11, %p166_p0 }
  0x1f   : > { %s2069_s7 = sand.u32 (!%p167_p1), 1, %s1941_s0   ;;  %s1610_s9 = sld [smem:[#allocation5 + $0x80]] (!%p167_p1)  ;;  %v1960_v0 = vmov (!%p167_p1), 0.0  }
  0x20   : > { %170 = sbr.rel (%p167_p1) target bundleno = 920 (0x398), region = 28  ;;  %s1607_s8 = sshll.u32 (!%p167_p1), %s2069_s7, 3 }
  0x21   : > { %s2072_s10 = scalar_lea.vmem (!%p167_p1), [#allocation6], %s1607_s8  ;;  %s2075_s11 = scalar_lea.vmem (!%p167_p1), [#allocation8], %s1607_s8 }
  0x22   : > { %194 = vst [vmem:[%s2072_s10] sm:$0xff] (!%p167_p1), %v1960_v0  ;;  %195 = vst [vmem:[%s2075_s11] sm:$0xff] (!%p167_p1), %v1960_v0  ;;  %s1609_s12 = sshll.u32 (!%p167_p1), %s1949_s22, 3  ;;  %s208_s13 = sld [smem:[#allocation5]] (!%p167_p1) }
  0x23   : > { %s1611_s14 = sld [smem:[#allocation5 + $0x180]] (!%p167_p1)  ;;  %s207_s15 = sadd.s32 (!%p167_p1), 7, %s1609_s12 }
  0x24   : > { %s1613_s16 = sld [smem:[#allocation5 + $0x100]] (!%p167_p1) }
  0x25   : > { %p206_p2 = scmp.le.s32.totalorder (!%p167_p1), %s1609_s12, %s1610_s9 }
  0x28   : > { %p209_p3 = scmp.ge.s32.totalorder %s207_s15, %s208_s13 }
  0x29   : > { %p1612_p5 = scmp.ge.s32.totalorder %s1611_s14, 0 }
  0x2a   : > { %p210_p4 = pnand %p209_p3, %p206_p2  ;;  %p1614_p8 = scmp.le.s32.totalorder %s1613_s16, 127 }
  0x2c   : > { %p211_p6 = pneg %p210_p4 }
  0x2e   : > { %p217_p7 = pnand %p1612_p5, %p211_p6 }
  0x30   : > { %p218_p10 = pneg %p217_p7 }
  0x32   : > { %p225_p11 = pnand %p1614_p8, %p218_p10 }
  0x34   : > { %228 = sbr.rel (%p225_p11) target bundleno = 872 (0x368), region = 36 }
  0x3b   : > { %v2082_v1 = vld [vmem:[%s2932_s2 + $0x8] sm:$0xff]  ;;  %v2087_v2 = vld [vmem:[%s2932_s2] sm:$0xff]  ;;  %s238_s26 = scvt.s32.f32 %s1609_s12  ;;  %v239_v3 = vlaneseq  ;;  %v1961_v4 = vmov 0   ;;  %v2095_v6 = vld [vmem:[%s2932_s2 + $0x10] sm:$0xff]  ;;  %v1962_v21 = vmov 1   ;;  %s1963_s28 = smov 64  }
  0x3c   : > { %1755 = vset.pattern.permute.xlu1 %v1961_v4  ;;  %1754 = vset.pattern.permute.xlu0 %v1961_v4  ;;  %v2100_v7 = vld [vmem:[%s2932_s2 + $0x20] sm:$0xff]  ;;  %v2110_v14 = vld [vmem:[%s2932_s2 + $0x18] sm:$0xff]  ;;  %v2115_v15 = vld [vmem:[%s2932_s2 + $0x30] sm:$0xff]  ;;  %vm252_vm0 = vcmask 523264   ;;  %v1964_v35 = vmov 2   ;;  %v1965_v36 = vmov 3  }
  0x3d   : > { %290 = vperm.xlu1 %1755, %v2082_v1   ;;  %285 = vperm.xlu0 %1754, %v2087_v2   ;;  %v240_v5 = vshrl.u32 %v239_v3, 7  ;;  %v229_v8 = vld [vmem:[%s2931_s1] sm:$0x7]  ;;  %v242_v9 = vstv %s238_s26  ;;  %v2122_v18 = vld [vmem:[%s2932_s2 + $0x28] sm:$0xff]  ;;  %v2128_v22 = vld [vmem:[%s2932_s2 + $0x38] sm:$0xff]  ;;  %v1966_v37 = vmov 12  }
  0x3e   : > { %2963 = vst [vmem:[#allocation13_spill] sm:$0xff] %v2128_v22  ;;  %v1967_v38 = vmov 4   ;;  %v1968_v39 = vmov 13   ;;  %v1969_v40 = vmov 5   ;;  %v1970_v41 = vmov 14  }
  0x3f   : > { %v241_v10 = vcvt.s32.f32 %v240_v5  ;;  %v256_v11 = vsub.s32 1, %v240_v5  ;;  %v270_v23 = vsub.s32 2, %v240_v5  ;;  %v246_v25 = vsub.s32 0, %v240_v5 }
  0x40   : > { %v1971_v48 = vmov 6   ;;  %vm266_vm1 = vcmask 1048064   ;;  %v1972_v57 = vmov 15   ;;  %v2937_v0 = vmov 17  }
  0x41   : > { %295 = vperm.xlu1 %1755, %v2095_v6   ;;  %305 = vperm.xlu0 %1754, %v2100_v7   ;;  %v243_v12 = vadd.f32 %v242_v9, %v241_v10  ;;  %v257_v13 = vrot.slane %v229_v8, %v256_v11  ;;  %v271_v24 = vrot.slane %v229_v8, %v270_v23  ;;  %v2945_v10 = vmov 16  }
  0x42   : > { %v247_v28 = vrot.slane %v229_v8, %v246_v25 }
  0x43   : > { %v258_v16 = vsub.f32 %v243_v12, %v257_v13  ;;  %v272_v26 = vsub.f32 %v243_v12, %v271_v24 }
  0x44   : > { %v248_v30 = vsub.f32 %v243_v12, %v247_v28  ;;  %v2941_v28 = vmov 8  }
  0x45   : > { %300 = vperm.xlu1 %1755, %v2110_v14   ;;  %315 = vperm.xlu0 %1754, %v2115_v15   ;;  %v259_v17 = vand.u32 2147483647, %v258_v16  ;;  %v273_v27 = vand.u32 2147483647, %v272_v26 }
  0x46   : > { %v249_v32 = vand.u32 2147483647, %v248_v30 }
  0x47   : > { %v260_v19 = vsub.f32 1.0, %v259_v17  ;;  %v274_v29 = vsub.f32 1.0, %v273_v27 }
  0x48   : > { %v250_v33 = vsub.f32 1.0, %v249_v32 }
  0x49   : > { %310 = vperm.xlu1 %1755, %v2122_v18   ;;  %v261_v20 = vmax.f32 %v260_v19, 0.0  ;;  %1756 = vset.pattern.permute.xlu0 %v1962_v21  ;;  %v275_v31 = vmax.f32 %v274_v29, 0.0 }
  0x4a   : > { %v251_v34 = vmax.f32 %v250_v33, 0.0 }
  0x4b   : > { %263 = vrot.lane.b32.xlu0 %v261_v20, %s1963_s28  ;;  %276 = vst.msk [vmem:[#allocation2 + $0x8] sm:$0xff] %vm252_vm0, %v275_v31  ;;  %v2939_v20 = vmov 7  }
  0x4c   : > { %253 = vst.msk [vmem:[#allocation2] sm:$0xff] %vm252_vm0, %v251_v34 }
  0x4d   : > { %320 = vperm.xlu1 %1755, %v2128_v22  }
  0x4f   : > { %356 = vperm.xlu0 %1756, %v2087_v2  }
  0x51   : > { %1757 = vset.pattern.permute.xlu1 %v1962_v21 }
  0x52   : > { %360 = vperm.xlu1 %1757, %v2082_v1  }
  0x53   : > { %368 = vperm.xlu0 %1756, %v2110_v14  }
  0x56   : > { %364 = vperm.xlu1 %1757, %v2095_v6  }
  0x57   : > { %376 = vperm.xlu0 %1756, %v2122_v18  }
  0x5a   : > { %372 = vperm.xlu1 %1757, %v2100_v7  }
  0x5b   : > { %384 = vperm.xlu0 %1756, %v2128_v22  }
  0x5e   : > { %380 = vperm.xlu1 %1757, %v2115_v15  }
  0x5f   : > { %1759 = vset.pattern.permute.xlu0 %v1964_v35 }
  0x60   : > { %424 = vperm.xlu0 %1759, %v2082_v1  }
  0x62   : > { %1758 = vset.pattern.permute.xlu1 %v1964_v35 }
  0x63   : > { %420 = vperm.xlu1 %1758, %v2087_v2  }
  0x64   : > { %436 = vperm.xlu0 %1759, %v2100_v7  }
  0x67   : > { %428 = vperm.xlu1 %1758, %v2095_v6  }
  0x68   : > { %444 = vperm.xlu0 %1759, %v2115_v15  }
  0x6b   : > { %432 = vperm.xlu1 %1758, %v2110_v14  }
  0x6c   : > { %1760 = vset.pattern.permute.xlu0 %v1965_v36 }
  0x6d   : > { %484 = vperm.xlu0 %1760, %v2087_v2  }
  0x6f   : > { %440 = vperm.xlu1 %1758, %v2122_v18  }
  0x71   : > { %496 = vperm.xlu0 %1760, %v2110_v14  }
  0x73   : > { %448 = vperm.xlu1 %1758, %v2128_v22  }
  0x75   : > { %504 = vperm.xlu0 %1760, %v2122_v18  }
  0x77   : > { %1761 = vset.pattern.permute.xlu1 %v1965_v36  ;;  %v2935_v36 = vmov 18  }
  0x78   : > { %488 = vperm.xlu1 %1761, %v2082_v1  }
  0x79   : > { %512 = vperm.xlu0 %1760, %v2128_v22  }
  0x7c   : > { %492 = vperm.xlu1 %1761, %v2095_v6  }
  0x7d   : > { %1763 = vset.pattern.permute.xlu0 %v1966_v37 }
  0x7e   : > { %528 = vperm.xlu0 %1763, %v2082_v1  }
  0x80   : > { %500 = vperm.xlu1 %1761, %v2100_v7  }
  0x82   : > { %540 = vperm.xlu0 %1763, %v2100_v7  }
  0x84   : > { %508 = vperm.xlu1 %1761, %v2115_v15  }
  0x86   : > { %548 = vperm.xlu0 %1763, %v2115_v15  }
  0x88   : > { %1762 = vset.pattern.permute.xlu1 %v1966_v37 }
  0x89   : > { %524 = vperm.xlu1 %1762, %v2087_v2  }
  0x8a   : > { %1764 = vset.pattern.permute.xlu0 %v1967_v38 }
  0x8b   : > { %564 = vperm.xlu0 %1764, %v2087_v2  }
  0x8d   : > { %532 = vperm.xlu1 %1762, %v2095_v6  }
  0x8f   : > { %576 = vperm.xlu0 %1764, %v2110_v14  }
  0x91   : > { %536 = vperm.xlu1 %1762, %v2110_v14  }
  0x93   : > { %584 = vperm.xlu0 %1764, %v2122_v18  }
  0x95   : > { %544 = vperm.xlu1 %1762, %v2122_v18  }
  0x97   : > { %592 = vperm.xlu0 %1764, %v2128_v22  }
  0x99   : > { %552 = vperm.xlu1 %1762, %v2128_v22  }
  0x9b   : > { %1767 = vset.pattern.permute.xlu0 %v1968_v39 }
  0x9c   : > { %616 = vperm.xlu0 %1767, %v2082_v1  }
  0x9d   : > { %1765 = vset.pattern.permute.xlu1 %v1967_v38 }
  0x9e   : > { %568 = vperm.xlu1 %1765, %v2082_v1  }
  0xa0   : > { %628 = vperm.xlu0 %1767, %v2100_v7  }
  0xa2   : > { %572 = vperm.xlu1 %1765, %v2095_v6  }
  0xa4   : > { %636 = vperm.xlu0 %1767, %v2115_v15  }
  0xa6   : > { %580 = vperm.xlu1 %1765, %v2100_v7  }
  0xa8   : > { %1768 = vset.pattern.permute.xlu0 %v1969_v40 }
  0xa9   : > { %660 = vperm.xlu0 %1768, %v2087_v2  }
  0xaa   : > { %588 = vperm.xlu1 %1765, %v2115_v15  }
  0xad   : > { %672 = vperm.xlu0 %1768, %v2110_v14  }
  0xae   : > { %1766 = vset.pattern.permute.xlu1 %v1968_v39 }
  0xaf   : > { %612 = vperm.xlu1 %1766, %v2087_v2  }
  0xb1   : > { %680 = vperm.xlu0 %1768, %v2122_v18  }
  0xb3   : > { %620 = vperm.xlu1 %1766, %v2095_v6  }
  0xb5   : > { %688 = vperm.xlu0 %1768, %v2128_v22  }
  0xb7   : > { %624 = vperm.xlu1 %1766, %v2110_v14  }
  0xb9   : > { %1771 = vset.pattern.permute.xlu0 %v1970_v41 }
  0xba   : > { %712 = vperm.xlu0 %1771, %v2082_v1  }
  0xbb   : > { %632 = vperm.xlu1 %1766, %v2122_v18  }
  0xbc   : > { %v2185_v42 = vpop.permute.xlu1 %290  ;;  %v2187_v43 = vpop.permute.xlu0 %285 }
  0xbe   : > { %724 = vperm.xlu0 %1771, %v2100_v7  }
  0xbf   : > { %640 = vperm.xlu1 %1766, %v2128_v22  }
  0xc0   : > { %v2191_v44 = vpop.permute.xlu1 %295  ;;  %v2193_v45 = vpop.permute.xlu0 %305 }
  0xc2   : > { %732 = vperm.xlu0 %1771, %v2115_v15  }
  0xc3   : > { %1769 = vset.pattern.permute.xlu1 %v1969_v40 }
  0xc4   : > { %v2196_v46 = vpop.permute.xlu1 %300  ;;  %664 = vperm.xlu1 %1769, %v2082_v1   ;;  %v2199_v47 = vpop.permute.xlu0 %315 }
  0xc6   : > { %1772 = vset.pattern.permute.xlu0 %v1971_v48 }
  0xc7   : > { %772 = vperm.xlu0 %1772, %v2087_v2  }
  0xc8   : > { %v2202_v49 = vpop.permute.xlu1 %310  ;;  %668 = vperm.xlu1 %1769, %v2095_v6   ;;  %v264_v50 = vpop.permute.xlu0 %263 }
  0xc9   : > { %267 = vst.msk [vmem:[#allocation2] sm:$0xff] %vm266_vm1, %v264_v50 }
  0xcb   : > { %784 = vperm.xlu0 %1772, %v2110_v14  }
  0xcc   : > { %v2206_v51 = vpop.permute.xlu1 %320  ;;  %676 = vperm.xlu1 %1769, %v2100_v7  }
  0xce   : > { %v2209_v52 = vpop.permute.xlu0 %356 }
  0xcf   : > { %792 = vperm.xlu0 %1772, %v2122_v18  }
  0xd0   : > { %684 = vperm.xlu1 %1769, %v2115_v15  }
  0xd1   : > { %v2213_v53 = vpop.permute.xlu1 %360 }
  0xd2   : > { %v2215_v54 = vpop.permute.xlu0 %368 }
  0xd3   : > { %800 = vperm.xlu0 %1772, %v2128_v22  }
  0xd4   : > { %1770 = vset.pattern.permute.xlu1 %v1970_v41 }
  0xd5   : > { %v2218_v55 = vpop.permute.xlu1 %364  ;;  %708 = vperm.xlu1 %1770, %v2087_v2  }
  0xd6   : > { %v2221_v56 = vpop.permute.xlu0 %376 }
  0xd7   : > { %1775 = vset.pattern.permute.xlu0 %v1972_v57 }
  0xd8   : > { %816 = vperm.xlu0 %1775, %v2082_v1  }
  0xd9   : > { %v2224_v58 = vpop.permute.xlu1 %372  ;;  %716 = vperm.xlu1 %1770, %v2095_v6  }
  0xda   : > { %v2227_v59 = vpop.permute.xlu0 %384 }
  0xdc   : > { %828 = vperm.xlu0 %1775, %v2100_v7  }
  0xdd   : > { %v2230_v60 = vpop.permute.xlu1 %380  ;;  %720 = vperm.xlu1 %1770, %v2110_v14  }
  0xdf   : > { %v2233_v61 = vpop.permute.xlu0 %424 }
  0xe0   : > { %836 = vperm.xlu0 %1775, %v2115_v15  }
  0xe1   : > { %728 = vperm.xlu1 %1770, %v2122_v18  }
  0xe2   : > { %v2237_v62 = vpop.permute.xlu1 %420 }
  0xe3   : > { %v2239_v63 = vpop.permute.xlu0 %436 }
  0xe4   : > { %1782 = vset.pattern.permute.xlu0 %v2937_v0 }
  0xe5   : > { %736 = vperm.xlu1 %1770, %v2128_v22   ;;  %1004 = vperm.xlu0 %1782, %v2095_v6  }
  0xe6   : > { %v2244_v4 = vpop.permute.xlu1 %428 }
  0xe7   : > { %v2246_v5 = vpop.permute.xlu0 %444 }
  0xe9   : > { %1773 = vset.pattern.permute.xlu1 %v1971_v48  ;;  %1016 = vperm.xlu0 %1782, %v2122_v18  }
  0xea   : > { %776 = vperm.xlu1 %1773, %v2082_v1   ;;  %v2250_v8 = vpop.permute.xlu1 %432 }
  0xec   : > { %v2252_v9 = vpop.permute.xlu0 %484 }
  0xed   : > { %1788 = vset.pattern.permute.xlu0 %v2945_v10 }
  0xee   : > { %780 = vperm.xlu1 %1773, %v2095_v6   ;;  %v2256_v11 = vpop.permute.xlu1 %440  ;;  %900 = vperm.xlu0 %1788, %v2087_v2  }
  0xf0   : > { %v2259_v12 = vpop.permute.xlu0 %496 }
  0xf2   : > { %788 = vperm.xlu1 %1773, %v2100_v7   ;;  %v2262_v13 = vpop.permute.xlu1 %448  ;;  %912 = vperm.xlu0 %1788, %v2110_v14  }
  0xf4   : > { %v2265_v16 = vpop.permute.xlu0 %504 }
  0xf6   : > { %796 = vperm.xlu1 %1773, %v2115_v15   ;;  %924 = vperm.xlu0 %1788, %v2115_v15  }
  0xf7   : > { %v2269_v17 = vpop.permute.xlu1 %488 }
  0xf8   : > { %v2271_v19 = vpop.permute.xlu0 %512 }
  0xf9   : > { %2964 = vst [vmem:[#allocation14_spill] sm:$0xff] %v2271_v19  ;;  %v2977_v19 = vmov 7  }
  0xfa   : > { %1774 = vset.pattern.permute.xlu1 %v1972_v57  ;;  %1790 = vset.pattern.permute.xlu0 %v2939_v20 }
  0xfb   : > { %812 = vperm.xlu1 %1774, %v2087_v2   ;;  %v2275_v21 = vpop.permute.xlu1 %492  ;;  %856 = vperm.xlu0 %1790, %v2082_v1  }
  0xfd   : > { %v2278_v23 = vpop.permute.xlu0 %528 }
  0xff   : > { %820 = vperm.xlu1 %1774, %v2095_v6   ;;  %v2281_v24 = vpop.permute.xlu1 %500  ;;  %868 = vperm.xlu0 %1790, %v2100_v7  }
 0x101   : > { %v2284_v25 = vpop.permute.xlu0 %540 }
 0x103   : > { %824 = vperm.xlu1 %1774, %v2110_v14   ;;  %v2287_v26 = vpop.permute.xlu1 %508  ;;  %880 = vperm.xlu0 %1790, %v2128_v22  }
 0x104   : > { %2965 = vst [vmem:[#allocation15_spill] sm:$0xff] %v2287_v26 }
 0x105   : > { %v2290_v27 = vpop.permute.xlu0 %548 }
 0x106   : > { %2966 = vst [vmem:[#allocation16_spill] sm:$0xff] %v2290_v27 }
 0x107   : > { %832 = vperm.xlu1 %1774, %v2122_v18   ;;  %1793 = vset.pattern.permute.xlu0 %v2941_v28 }
 0x108   : > { %v2294_v29 = vpop.permute.xlu1 %524  ;;  %948 = vperm.xlu0 %1793, %v2087_v2  }
 0x10a   : > { %v2297_v30 = vpop.permute.xlu0 %564 }
 0x10b   : > { %840 = vperm.xlu1 %1774, %v2128_v22  }
 0x10c   : > { %v2300_v31 = vpop.permute.xlu1 %532  ;;  %960 = vperm.xlu0 %1793, %v2110_v14  }
 0x10d   : > { %2967 = vst [vmem:[#allocation17_spill] sm:$0xff] %v2300_v31 }
 0x10e   : > { %v2303_v32 = vpop.permute.xlu0 %576 }
 0x10f   : > { %1776 = vset.pattern.permute.xlu1 %v2945_v10 }
 0x110   : > { %904 = vperm.xlu1 %1776, %v2082_v1   ;;  %v2307_v33 = vpop.permute.xlu1 %536  ;;  %972 = vperm.xlu0 %1793, %v2115_v15  }
 0x111   : > { %2968 = vst [vmem:[#allocation18_spill] sm:$0xff] %v2307_v33 }
 0x112   : > { %v2310_v34 = vpop.permute.xlu0 %584 }
 0x114   : > { %1777 = vset.pattern.permute.xlu1 %v2939_v20  ;;  %v2313_v35 = vpop.permute.xlu1 %544  ;;  %1797 = vset.pattern.permute.xlu0 %v2935_v36  ;;  %v2943_v36 = vmov 9  }
 0x115   : > { %2969 = vst [vmem:[#allocation19_spill] sm:$0xff] %v2313_v35  ;;  %852 = vperm.xlu1 %1777, %v2087_v2   ;;  %1104 = vperm.xlu0 %1797, %v2082_v1  }
 0x116   : > { %v2318_v37 = vpop.permute.xlu0 %592 }
 0x117   : > { %2970 = vst [vmem:[#allocation20_spill] sm:$0xff] %v2318_v37 }
 0x118   : > { %v2320_v38 = vpop.permute.xlu1 %552 }
 0x119   : > { %2971 = vst [vmem:[#allocation21_spill] sm:$0xff] %v2320_v38  ;;  %1778 = vset.pattern.permute.xlu1 %v2937_v0  ;;  %1112 = vperm.xlu0 %1797, %v2110_v14  }
 0x11a   : > { %996 = vperm.xlu1 %1778, %v2087_v2  }
 0x11b   : > { %v2325_v39 = vpop.permute.xlu0 %616 }
 0x11d   : > { %v2327_v40 = vpop.permute.xlu1 %568  ;;  %1120 = vperm.xlu0 %1797, %v2122_v18  }
 0x11e   : > { %1000 = vperm.xlu1 %1778, %v2082_v1  }
 0x11f   : > { %v2331_v41 = vpop.permute.xlu0 %628 }
 0x120   : > { %2972 = vst [vmem:[#allocation22_spill] sm:$0xff] %v2331_v41 }
 0x121   : > { %v2333_v48 = vpop.permute.xlu1 %572  ;;  %1128 = vperm.xlu0 %1797, %v2128_v22  }
 0x122   : > { %2973 = vst [vmem:[#allocation23_spill] sm:$0xff] %v2333_v48  ;;  %1779 = vset.pattern.permute.xlu1 %v2941_v28  ;;  %v279_v28 = vand.u32 127, %v239_v3 }
 0x123   : > { %952 = vperm.xlu1 %1779, %v2082_v1   ;;  %v2338_v50 = vpop.permute.xlu0 %636 }
 0x124   : > { %2974 = vst [vmem:[#allocation24_spill] sm:$0xff] %v2338_v50 }
 0x125   : > { %v2340_v57 = vpop.permute.xlu1 %580  ;;  %1816 = vset.pattern.permute.xlu0 %v2943_v36  ;;  %v2356_v36 = vcvt.s32.f32 %v279_v28 }
 0x126   : > { %2975 = vst [vmem:[#allocation25_spill] sm:$0xff] %v2340_v57  ;;  %1060 = vperm.xlu0 %1816, %v2087_v2   ;;  %v2982_v57 = vmov 17  }
 0x127   : > { %1780 = vset.pattern.permute.xlu1 %v2945_v10  ;;  %v324_v3 = vsub.f32 %v2356_v36, %v2185_v42  ;;  %v325_v28 = vsub.f32 %v2356_v36, %v2191_v44  ;;  %v327_v35 = vsub.f32 %v2356_v36, %v2193_v45  ;;  %v328_v42 = vsub.f32 %v2356_v36, %v2202_v49 }
 0x128   : > { %908 = vperm.xlu1 %1780, %v2095_v6   ;;  %v2346_v0 = vpop.permute.xlu0 %660  ;;  %v2947_v45 = vmov 10  }
 0x129   : > { %v2348_v20 = vpop.permute.xlu1 %588  ;;  %v332_v33 = vand.u32 2147483647, %v324_v3  ;;  %v336_v49 = vand.u32 2147483647, %v328_v42  ;;  %v2984_v3 = vmov 8  }
 0x12a   : > { %2976 = vst [vmem:[#allocation26_spill] sm:$0xff] %v2348_v20  ;;  %1068 = vperm.xlu0 %1816, %v2095_v6   ;;  %v323_v20 = vsub.f32 %v2356_v36, %v2187_v43  ;;  %v329_v43 = vsub.f32 %v2356_v36, %v2199_v47 }
 0x12b   : > { %v340_v47 = vsub.f32 1.0, %v332_v33 }
 0x12c   : > { %1781 = vset.pattern.permute.xlu1 %v2977_v19  ;;  %v2353_v38 = vpop.permute.xlu0 %672  ;;  %v331_v41 = vand.u32 2147483647, %v323_v20  ;;  %v337_v31 = vand.u32 2147483647, %v329_v43  ;;  %v330_v20 = vsub.f32 %v2356_v36, %v2206_v51 }
 0x12d   : > { %2978 = vst [vmem:[#allocation27_spill] sm:$0xff] %v2353_v38  ;;  %860 = vperm.xlu1 %1781, %v2095_v6   ;;  %v2400_v33 = vmax.f32 %v340_v47, 0.0  ;;  %v391_v47 = vsub.f32 %v2356_v36, %v2224_v58  ;;  %v453_v58 = vsub.f32 %v2356_v36, %v2244_v4 }
 0x12e   : > { %v2358_v37 = vpop.permute.xlu1 %612  ;;  %1076 = vperm.xlu0 %1816, %v2100_v7   ;;  %v339_v27 = vsub.f32 1.0, %v331_v41  ;;  %v338_v51 = vand.u32 2147483647, %v330_v20 }
 0x130   : > { %v2361_v10 = vpop.permute.xlu0 %680  ;;  %v2402_v41 = vmax.f32 %v339_v27, 0.0  ;;  %v388_v27 = vsub.f32 %v2356_v36, %v2213_v53  ;;  %v346_v53 = vsub.f32 1.0, %v338_v51 }
 0x131   : > { %2979 = vst [vmem:[#allocation28_spill] sm:$0xff] %v2361_v10  ;;  %864 = vperm.xlu1 %1781, %v2110_v14   ;;  %v326_v10 = vsub.f32 %v2356_v36, %v2196_v46  ;;  %v333_v46 = vand.u32 2147483647, %v325_v28 }
 0x132   : > { %v2368_v50 = vpop.permute.xlu1 %620  ;;  %1084 = vperm.xlu0 %1816, %v2115_v15  }
 0x133   : > { %2980 = vst [vmem:[#allocation29_spill] sm:$0xff] %v2368_v50  ;;  %v335_v50 = vand.u32 2147483647, %v327_v35  ;;  %v341_v26 = vsub.f32 1.0, %v333_v46  ;;  %v345_v35 = vsub.f32 1.0, %v337_v31 }
 0x134   : > { %v2377_v38 = vpop.permute.xlu0 %688 }
 0x135   : > { %2981 = vst [vmem:[#allocation30_spill] sm:$0xff] %v2377_v38  ;;  %1783 = vset.pattern.permute.xlu1 %v2982_v57  ;;  %v334_v38 = vand.u32 2147483647, %v326_v10  ;;  %v344_v10 = vsub.f32 1.0, %v336_v49  ;;  %v2406_v43 = vmax.f32 %v341_v26, 0.0  ;;  %v389_v26 = vsub.f32 %v2356_v36, %v2218_v55 }
 0x136   : > { %1008 = vperm.xlu1 %1783, %v2110_v14   ;;  %v2385_v44 = vpop.permute.xlu1 %624  ;;  %1818 = vset.pattern.permute.xlu0 %v2947_v45  ;;  %v343_v45 = vsub.f32 1.0, %v335_v50  ;;  %v387_v50 = vsub.f32 %v2356_v36, %v2209_v52  ;;  %v2425_v52 = vmax.f32 %v345_v35, 0.0  ;;  %v392_v49 = vsub.f32 %v2356_v36, %v2221_v56 }
 0x137   : > { %2983 = vst [vmem:[#allocation31_spill] sm:$0xff] %v2385_v44  ;;  %1144 = vperm.xlu0 %1818, %v2082_v1   ;;  %v342_v1 = vsub.f32 1.0, %v334_v38  ;;  %v390_v38 = vsub.f32 %v2356_v36, %v2215_v54  ;;  %v394_v54 = vsub.f32 %v2356_v36, %v2227_v59  ;;  %v393_v55 = vsub.f32 %v2356_v36, %v2230_v60 }
 0x138   : > { %v2408_v46 = vmax.f32 %v343_v45, 0.0  ;;  %v2423_v45 = vmax.f32 %v344_v10, 0.0  ;;  %2990 = vst [vmem:[#allocation36_spill] sm:$0xff] %v2425_v52  ;;  %v395_v10 = vand.u32 2147483647, %v387_v50  ;;  %v451_v35 = vsub.f32 %v2356_v36, %v2237_v62 }
 0x139   : > { %v2389_v48 = vpop.permute.xlu0 %712  ;;  %v2414_v31 = vmax.f32 %v342_v1, 0.0  ;;  %v452_v1 = vsub.f32 %v2356_v36, %v2233_v61  ;;  %v455_v56 = vsub.f32 %v2356_v36, %v2239_v63  ;;  %v396_v59 = vand.u32 2147483647, %v388_v27 }
 0x13a   : > { %1784 = vset.pattern.permute.xlu1 %v2984_v3  ;;  %v2394_v44 = vpop.permute.xlu1 %632  ;;  %2988 = vst [vmem:[#allocation35_spill] sm:$0xff] %v2408_v46  ;;  %v397_v60 = vand.u32 2147483647, %v389_v26  ;;  %v400_v61 = vand.u32 2147483647, %v392_v49  ;;  %v457_v62 = vsub.f32 %v2356_v36, %v2246_v5  ;;  %v454_v63 = vsub.f32 %v2356_v36, %v2250_v8 }
 0x13b   : > { %2985 = vst [vmem:[#allocation32_spill] sm:$0xff] %v2394_v44  ;;  %956 = vperm.xlu1 %1784, %v2095_v6   ;;  %1152 = vperm.xlu0 %1818, %v2110_v14   ;;  %v2989_v14 = vmov 16   ;;  %v399_v50 = vand.u32 2147483647, %v391_v47  ;;  %v460_v4 = vand.u32 2147483647, %v452_v1 }
 0x13c   : > { %v461_v27 = vand.u32 2147483647, %v453_v58  ;;  %v2952_v26 = vmov 11   ;;  %v2458_v49 = vmax.f32 %v346_v53, 0.0  ;;  %v403_v47 = vsub.f32 1.0, %v395_v10 }
 0x13d   : > { %v2398_v28 = vpop.permute.xlu0 %724  ;;  %v404_v5 = vsub.f32 1.0, %v396_v59  ;;  %v405_v8 = vsub.f32 1.0, %v397_v60  ;;  %v462_v1 = vand.u32 2147483647, %v454_v63  ;;  %v456_v53 = vsub.f32 %v2356_v36, %v2256_v11 }
 0x13e   : > { %2986 = vst [vmem:[#allocation33_spill] sm:$0xff] %v2398_v28  ;;  %v2404_v42 = vpop.permute.xlu1 %640  ;;  %v401_v28 = vand.u32 2147483647, %v393_v55  ;;  %2993 = vst [vmem:[#allocation39_spill] sm:$0xff] %v2458_v49  ;;  %v465_v55 = vand.u32 2147483647, %v457_v62 }
 0x13f   : > { %2987 = vst [vmem:[#allocation34_spill] sm:$0xff] %v2404_v42  ;;  %1785 = vset.pattern.permute.xlu1 %v2989_v14  ;;  %1160 = vperm.xlu0 %1818, %v2122_v18   ;;  %v402_v42 = vand.u32 2147483647, %v394_v54  ;;  %v459_v14 = vand.u32 2147483647, %v451_v35  ;;  %v408_v54 = vsub.f32 1.0, %v400_v61 }
 0x140   : > { %916 = vperm.xlu1 %1785, %v2100_v7   ;;  %v407_v35 = vsub.f32 1.0, %v399_v50  ;;  %v409_v58 = vsub.f32 1.0, %v401_v28  ;;  %v468_v10 = vsub.f32 1.0, %v460_v4  ;;  %v2471_v60 = vmax.f32 %v404_v5, 0.0 }
 0x141   : > { %v2431_v20 = vpop.permute.xlu0 %732  ;;  %v458_v28 = vsub.f32 %v2356_v36, %v2262_v13  ;;  %v2478_v11 = vmax.f32 %v405_v8, 0.0  ;;  %v515_v5 = vmul.f32 %v2252_v9, %v2402_v41 }
 0x142   : > { %2991 = vst [vmem:[#allocation37_spill] sm:$0xff] %v2431_v20  ;;  %v398_v20 = vand.u32 2147483647, %v390_v38  ;;  %v2483_v50 = vmax.f32 %v407_v35, 0.0  ;;  %v2487_v63 = vmax.f32 %v409_v58, 0.0  ;;  %v518_v58 = vmul.f32 %v2259_v12, %v2414_v31 }
 0x143   : > { %v2445_v51 = vpop.permute.xlu1 %664  ;;  %1168 = vperm.xlu0 %1818, %v2128_v22   ;;  %v463_v22 = vand.u32 2147483647, %v455_v56  ;;  %v410_v56 = vsub.f32 1.0, %v402_v42  ;;  %v2480_v42 = vmax.f32 %v408_v54, 0.0  ;;  %v466_v8 = vand.u32 2147483647, %v458_v28 }
 0x144   : > { %920 = vperm.xlu1 %1785, %v2122_v18   ;;  %v406_v52 = vsub.f32 1.0, %v398_v20  ;;  %v467_v20 = vsub.f32 1.0, %v459_v14  ;;  %v473_v14 = vsub.f32 1.0, %v465_v55  ;;  %v596_v55 = vmul.f32 %v2327_v40, %v2471_v60 }
 0x145   : > { %v471_v59 = vsub.f32 1.0, %v463_v22  ;;  %v470_v22 = vsub.f32 1.0, %v462_v1  ;;  %v2485_v62 = vmax.f32 %v410_v56, 0.0 }
 0x146   : > { %v2453_v44 = vpop.permute.xlu0 %772  ;;  %v2473_v61 = vmax.f32 %v406_v52, 0.0  ;;  %v464_v52 = vand.u32 2147483647, %v456_v53  ;;  %v2494_v36 = vmax.f32 %v467_v20, 0.0  ;;  %v2509_v1 = vmax.f32 %v473_v14, 0.0 }
 0x147   : > { %2992 = vst [vmem:[#allocation38_spill] sm:$0xff] %v2453_v44  ;;  %v2455_v38 = vpop.permute.xlu1 %668  ;;  %1821 = vset.pattern.permute.xlu0 %v2952_v26  ;;  %v469_v44 = vsub.f32 1.0, %v461_v27  ;;  %v2496_v4 = vmax.f32 %v471_v59, 0.0  ;;  %v2511_v35 = vmax.f32 %v470_v22, 0.0 }
 0x148   : > { %1786 = vset.pattern.permute.xlu1 %v2977_v19  ;;  %1236 = vperm.xlu0 %1821, %v2087_v2   ;;  %v2469_v2 = vmax.f32 %v403_v47, 0.0  ;;  %v472_v9 = vsub.f32 1.0, %v464_v52  ;;  %v691_v59 = vmul.f32 %v2346_v0, %v2494_v36  ;;  %v598_v22 = vmul.f32 %v2303_v32, %v2473_v61  ;;  %v2999_v32 = vld [vmem:[#allocation23_spill] sm:$0xff] }
 0x149   : > { %872 = vperm.xlu1 %1786, %v2122_v18   ;;  %v2498_v27 = vmax.f32 %v469_v44, 0.0  ;;  %v644_v44 = vmul.f32 %v2325_v39, %v2471_v60  ;;  %v520_v39 = vmul.f32 %v2265_v16, %v2423_v45  ;;  %v517_v16 = vmul.f32 %v2275_v21, %v2406_v43 }
 0x14a   : > { %v2465_v26 = vpop.permute.xlu0 %784  ;;  %2994 = vst [vmem:[#allocation40_spill] sm:$0xff] %v2469_v2  ;;  %v595_v54 = vmul.f32 %v2297_v30, %v2469_v2  ;;  %v643_v56 = vmul.f32 %v2358_v37, %v2469_v2  ;;  %v516_v30 = vmul.f32 %v2269_v17, %v2400_v33  ;;  %v556_v37 = vmul.f32 %v2278_v23, %v2400_v33 }
 0x14b   : > { %v2467_v49 = vpop.permute.xlu1 %676  ;;  %v474_v17 = vsub.f32 1.0, %v466_v8  ;;  %v600_v52 = vmul.f32 %v2310_v34, %v2480_v42  ;;  %v2955_v34 = vmov 20  }
 0x14c   : > { %1244 = vperm.xlu0 %1821, %v2095_v6   ;;  %v2492_v6 = vmax.f32 %v468_v10, 0.0  ;;  %v555_v10 = vmul.f32 %v2294_v29, %v2402_v41  ;;  %v604_v20 = vadd.f32 %v596_v55, %v516_v30  ;;  %v652_v23 = vadd.f32 %v644_v44, %v556_v37  ;;  %v2997_v55 = vld [vmem:[#allocation15_spill] sm:$0xff] }
 0x14d   : > { %1787 = vset.pattern.permute.xlu1 %v2982_v57 }
 0x14e   : > { %1012 = vperm.xlu1 %1787, %v2100_v7   ;;  %v2490_v13 = vpop.permute.xlu0 %792  ;;  %v692_v40 = vmul.f32 %v2445_v51, %v2492_v6  ;;  %v740_v12 = vmul.f32 %v2389_v48, %v2492_v6  ;;  %v603_v51 = vadd.f32 %v595_v54, %v515_v5  ;;  %v651_v14 = vadd.f32 %v643_v56, %v555_v10  ;;  %v2996_v54 = vld [vmem:[#allocation36_spill] sm:$0xff]  ;;  %v3001_v10 = vld [vmem:[#allocation29_spill] sm:$0xff] }
 0x14f   : > { %2995 = vst [vmem:[#allocation41_spill] sm:$0xff] %v2490_v13  ;;  %v2500_v47 = vpop.permute.xlu1 %684  ;;  %v519_v48 = vmul.f32 %v2281_v24, %v2408_v46  ;;  %v2554_v44 = vmul.f32 %v2997_v55, %v2996_v54  ;;  %v2998_v24 = vld [vmem:[#allocation16_spill] sm:$0xff]  ;;  %v597_v56 = vmul.f32 %v2999_v32, %v2478_v11  ;;  %v3004_v32 = vld [vmem:[#allocation18_spill] sm:$0xff]  ;;  %v3005_v13 = vmov 16  }
 0x150   : > { %1252 = vperm.xlu0 %1821, %v2100_v7   ;;  %v700_v0 = vadd.f32 %v692_v40, %v604_v20  ;;  %v748_v8 = vadd.f32 %v740_v12, %v652_v23  ;;  %v699_v30 = vadd.f32 %v691_v59, %v603_v51  ;;  %v645_v12 = vmul.f32 %v3001_v10, %v2478_v11  ;;  %v3002_v20 = vld [vmem:[#allocation31_spill] sm:$0xff] }
 0x151   : > { %v693_v51 = vmul.f32 %v2455_v38, %v2498_v27 }
 0x152   : > { %1789 = vset.pattern.permute.xlu1 %v2984_v3  ;;  %v2524_v53 = vpop.permute.xlu0 %800  ;;  %v1624_v59 = vpack.c.bf16 %v700_v0, %v699_v30  ;;  %v3009_v30 = vld [vmem:[#allocation13_spill] sm:$0xff] }
 0x153   : > { %964 = vperm.xlu1 %1789, %v2100_v7   ;;  %v559_v7 = vmul.f32 %v2284_v25, %v2408_v46  ;;  %v2558_v25 = vmul.f32 %v2998_v24, %v2996_v54  ;;  %v2573_v24 = vmax.f32 %v472_v9, 0.0  ;;  %v3008_v9 = vld [vmem:[#allocation27_spill] sm:$0xff] }
 0x154   : > { %v709_v28 = vpop.permute.xlu1 %708  ;;  %1260 = vperm.xlu0 %1821, %v2115_v15   ;;  %v694_v0 = vmul.f32 %v3008_v9, %v2511_v35 }
 0x155   : > { %v739_v29 = vmul.f32 %v709_v28, %v2494_v36  ;;  %v646_v28 = vmul.f32 %v3002_v20, %v2473_v61 }
 0x157   : > { %968 = vperm.xlu1 %1789, %v2122_v18   ;;  %v2550_v21 = vpop.permute.xlu0 %816  ;;  %v747_v5 = vadd.f32 %v739_v29, %v651_v14  ;;  %v3000_v18 = vld [vmem:[#allocation17_spill] sm:$0xff]  ;;  %v606_v14 = vadd.f32 %v598_v22, %v518_v58  ;;  %v3003_v29 = vld [vmem:[#allocation22_spill] sm:$0xff]  ;;  %v2581_v58 = vmax.f32 %v474_v17, 0.0  ;;  %v605_v22 = vadd.f32 %v597_v56, %v517_v16  ;;  %v3011_v17 = vld [vmem:[#allocation19_spill] sm:$0xff] }
 0x158   : > { %v717_v40 = vpop.permute.xlu1 %716  ;;  %1824 = vset.pattern.permute.xlu0 %v2955_v34  ;;  %v557_v37 = vmul.f32 %v3000_v18, %v2406_v43  ;;  %v647_v55 = vmul.f32 %v3003_v29, %v2483_v50  ;;  %v558_v18 = vmul.f32 %v3004_v32, %v2414_v31  ;;  %v608_v34 = vadd.f32 %v600_v52, %v520_v39 }
 0x159   : > { %v1622_v23 = vpack.c.bf16 %v748_v8, %v747_v5  ;;  %v741_v10 = vmul.f32 %v717_v40, %v2498_v27  ;;  %v3007_v8 = vld [vmem:[#allocation25_spill] sm:$0xff]  ;;  %v560_v16 = vmul.f32 %v3011_v17, %v2423_v45  ;;  %v701_v29 = vadd.f32 %v693_v51, %v605_v22  ;;  %v3016_v22 = vld [vmem:[#allocation34_spill] sm:$0xff] }
 0x15a   : > { %v599_v38 = vmul.f32 %v3007_v8, %v2483_v50  ;;  %v653_v39 = vadd.f32 %v645_v12, %v557_v37  ;;  %v654_v52 = vadd.f32 %v646_v28, %v558_v18  ;;  %v655_v56 = vadd.f32 %v647_v55, %v559_v7  ;;  %v3012_v8 = vld [vmem:[#allocation24_spill] sm:$0xff] }
 0x15b   : > { %1791 = vset.pattern.permute.xlu1 %v3005_v13  ;;  %1623 = vmatprep.subr.bf16.mxu0 %v1622_v23  ;;  %v2579_v5 = vpop.permute.xlu0 %828  ;;  %v3010_v13 = vld [vmem:[#allocation32_spill] sm:$0xff]  ;;  %v695_v32 = vmul.f32 %v2467_v49, %v2496_v4  ;;  %v649_v9 = vmul.f32 %v3012_v8, %v2487_v63  ;;  %v702_v46 = vadd.f32 %v694_v0, %v606_v14 }
 0x15c   : > { %3006 = vst [vmem:[#allocation36_spill] sm:$0xff] %v2579_v5  ;;  %928 = vperm.xlu1 %1791, %v3009_v30   ;;  %v721_v20 = vpop.permute.xlu1 %720  ;;  %1625 = vmatpush1.bf16.msra.mxu0 %v1624_v59  ;;  %v648_v40 = vmul.f32 %v3010_v13, %v2480_v42  ;;  %v3013_v59 = vld [vmem:[#allocation33_spill] sm:$0xff]  ;;  %v749_v12 = vadd.f32 %v741_v10, %v653_v39  ;;  %v3015_v7 = vld [vmem:[#allocation28_spill] sm:$0xff] }
 0x15d   : > { %v742_v23 = vmul.f32 %v721_v20, %v2511_v35  ;;  %v743_v37 = vmul.f32 %v3013_v59, %v2496_v4  ;;  %v607_v13 = vadd.f32 %v599_v38, %v519_v48  ;;  %v3014_v20 = vld [vmem:[#allocation26_spill] sm:$0xff]  ;;  %v696_v55 = vmul.f32 %v3015_v7, %v2573_v24  ;;  %v3017_v48 = vld [vmem:[#allocation20_spill] sm:$0xff] }
 0x15e   : > { %v601_v5 = vmul.f32 %v3014_v20, %v2487_v63  ;;  %v656_v51 = vadd.f32 %v648_v40, %v560_v16  ;;  %v650_v17 = vmul.f32 %v3016_v22, %v2485_v62  ;;  %v602_v38 = vmul.f32 %v3017_v48, %v2485_v62  ;;  %v3020_v16 = vld [vmem:[#allocation37_spill] sm:$0xff]  ;;  %v3021_v7 = vld [vmem:[#allocation14_spill] sm:$0xff] }
 0x15f   : > { %v750_v28 = vadd.f32 %v742_v23, %v654_v52  ;;  %v837_v18 = vpop.permute.xlu0 %836  ;;  %v703_v39 = vadd.f32 %v695_v32, %v607_v13  ;;  %v697_v14 = vmul.f32 %v2500_v47, %v2509_v1  ;;  %v1628_v0 = vpack.c.bf16 %v702_v46, %v701_v29  ;;  %v3018_v52 = vld [vmem:[#allocation39_spill] sm:$0xff]  ;;  %v3022_v32 = vld [vmem:[#allocation30_spill] sm:$0xff] }
 0x160   : > { %1792 = vset.pattern.permute.xlu1 %v2977_v19  ;;  %v729_v49 = vpop.permute.xlu1 %728  ;;  %v3019_v19 = vld [vmem:[#allocation21_spill] sm:$0xff]  ;;  %v751_v40 = vadd.f32 %v743_v37, %v655_v56  ;;  %v745_v59 = vmul.f32 %v3020_v16, %v2509_v1  ;;  %v698_v13 = vmul.f32 %v3022_v32, %v2581_v58  ;;  %v657_v56 = vadd.f32 %v649_v9, %v2558_v25 }
 0x161   : > { %v744_v8 = vmul.f32 %v729_v49, %v2573_v24  ;;  %876 = vperm.xlu1 %1792, %v2115_v15   ;;  %v1626_v10 = vpack.c.bf16 %v750_v28, %v749_v12  ;;  %v562_v23 = vmul.f32 %v3019_v19, %v3018_v52  ;;  %v522_v12 = vmul.f32 %v3021_v7, %v3018_v52 }
 0x162   : > { %v609_v28 = vadd.f32 %v601_v5, %v2554_v44  ;;  %v704_v49 = vadd.f32 %v696_v55, %v608_v34  ;;  %v753_v34 = vadd.f32 %v745_v59, %v657_v56  ;;  %v810_v32 = vmul.f32 %v2524_v53, %v3018_v52 }
 0x163   : > { %v752_v20 = vadd.f32 %v744_v8, %v656_v51  ;;  %1627 = vmatprep.subr.bf16.mxu0 %v1626_v10  ;;  %v658_v29 = vadd.f32 %v650_v17, %v562_v23  ;;  %v610_v22 = vadd.f32 %v602_v38, %v522_v12  ;;  %v3024_v12 = vmov 9  }
 0x164   : > { %v737_v47 = vpop.permute.xlu1 %736  ;;  %1629 = vmatpush1.bf16.msra.mxu0 %v1628_v0  ;;  %v2621_v46 = vpop.permute.xlu0 %1004  ;;  %v705_v8 = vadd.f32 %v697_v14, %v609_v28  ;;  %v1632_v44 = vpack.c.bf16 %v704_v49, %v703_v39  ;;  %v3023_v39 = vmov 18   ;;  %v849_v14 = vmul.f32 %v837_v18, %v2996_v54  ;;  %v1825_v0 = vld [vmem:[%s2932_s2] sm:$0xff]  ;;  %v1826_v18 = vld [vmem:[%s2932_s2 + $0x8] sm:$0xff] }
 0x165   : > { %v746_v37 = vmul.f32 %v737_v47, %v2581_v58  ;;  %1794 = vset.pattern.permute.xlu1 %v2982_v57  ;;  %v1630_v51 = vpack.c.bf16 %v752_v20, %v751_v40  ;;  %v706_v55 = vadd.f32 %v698_v13, %v610_v22  ;;  %v3025_v56 = vmov 10  }
 0x166   : > { %1020 = vperm.xlu1 %1794, %v2115_v15  }
 0x167   : > { %v754_v5 = vadd.f32 %v746_v37, %v658_v29  ;;  %1631 = vmatprep.subr.bf16.mxu0 %v1630_v51  ;;  %v1636_v9 = vpack.c.bf16 %v706_v55, %v705_v8  ;;  %v3026_v51 = vmov 20   ;;  %v3027_v8 = vmov 11  }
 0x168   : > { %1633 = vmatpush1.bf16.msra.mxu0 %v1632_v44  ;;  %v2627_v10 = vpop.permute.xlu0 %1016 }
 0x169   : > { %v2629_v48 = vpop.permute.xlu1 %776  ;;  %v1634_v25 = vpack.c.bf16 %v754_v5, %v753_v34 }
 0x16a   : > { %1024 = vperm.xlu1 %1794, %v3009_v30  }
 0x16b   : > { %1635 = vmatprep.subr.bf16.mxu0 %v1634_v25  ;;  %v1827_v25 = vld [vmem:[%s2932_s2 + $0x10] sm:$0xff] }
 0x16c   : > { %1637 = vmatpush1.bf16.msra.mxu0 %v1636_v9  ;;  %v844_v9 = vmul.f32 %v2550_v21, %v2400_v33 }
 0x16d   : > { %v2632_v57 = vpop.permute.xlu1 %780  ;;  %v901_v17 = vpop.permute.xlu0 %900 }
 0x16e   : > { %1795 = vset.pattern.permute.xlu1 %v2984_v3  ;;  %v931_v34 = vmul.f32 %v901_v17, %v2469_v2 }
 0x16f   : > { %976 = vperm.xlu1 %1795, %v3009_v30   ;;  %v1982_v30 = vmov 19  }
 0x171   : > { %v2636_v15 = vpop.permute.xlu1 %788  ;;  %v2638_v38 = vpop.permute.xlu0 %912 }
 0x173   : > { %1796 = vset.pattern.permute.xlu1 %v3023_v39 }
 0x174   : > { %1100 = vperm.xlu1 %1796, %v1825_v0  }
 0x175   : > { %v2645_v19 = vpop.permute.xlu1 %796  ;;  %v925_v23 = vpop.permute.xlu0 %924 }
 0x176   : > { %v937_v3 = vmul.f32 %v925_v23, %v2487_v63 }
 0x178   : > { %v2648_v40 = vadd.f32 %v937_v3, %v849_v14  ;;  %1798 = vset.pattern.permute.xlu1 %v1982_v30 }
 0x179   : > { %1188 = vperm.xlu1 %1798, %v1825_v0  }
 0x17a   : > { %v813_v16 = vpop.permute.xlu1 %812  ;;  %v857_v59 = vpop.permute.xlu0 %856 }
 0x17b   : > { %v843_v5 = vmul.f32 %v813_v16, %v2402_v41  ;;  %v3028_v16 = vld [vmem:[#allocation38_spill] sm:$0xff] }
 0x17d   : > { %1192 = vperm.xlu1 %1798, %v1826_v18   ;;  %v939_v3 = vadd.f32 %v931_v34, %v843_v5 }
 0x17e   : > { %v2654_v20 = vpop.permute.xlu1 %820  ;;  %v2656_v7 = vpop.permute.xlu0 %868 }
 0x181   : > { %1799 = vset.pattern.permute.xlu1 %v3024_v12 }
 0x182   : > { %1064 = vperm.xlu1 %1799, %v1826_v18   ;;  %v825_v28 = vpop.permute.xlu1 %824  ;;  %v881_v49 = vpop.permute.xlu0 %880 }
 0x183   : > { %v890_v13 = vmul.f32 %v881_v49, %v2485_v62  ;;  %v803_v49 = vmul.f32 %v3028_v16, %v2402_v41  ;;  %v845_v16 = vmul.f32 %v2654_v20, %v2406_v43 }
 0x185   : > { %v2662_v47 = vadd.f32 %v890_v13, %v810_v32  ;;  %v884_v32 = vmul.f32 %v857_v59, %v2471_v60 }
 0x186   : > { %1800 = vset.pattern.permute.xlu1 %v3025_v56  ;;  %v2665_v29 = vpop.permute.xlu1 %832 }
 0x187   : > { %1140 = vperm.xlu1 %1800, %v1825_v0   ;;  %v949_v13 = vpop.permute.xlu0 %948 }
 0x18a   : > { %v2667_v37 = vpop.permute.xlu1 %840 }
 0x18b   : > { %1801 = vset.pattern.permute.xlu1 %v3026_v51  ;;  %v961_v20 = vpop.permute.xlu0 %960 }
 0x18c   : > { %1284 = vperm.xlu1 %1801, %v1825_v0  }
 0x18f   : > { %v905_v22 = vpop.permute.xlu1 %904 }
 0x190   : > { %1288 = vperm.xlu1 %1801, %v1826_v18   ;;  %v932_v55 = vmul.f32 %v905_v22, %v2471_v60 }
 0x194   : > { %1802 = vset.pattern.permute.xlu1 %v3027_v8  ;;  %v853_v44 = vpop.permute.xlu1 %852 }
 0x195   : > { %1240 = vperm.xlu1 %1802, %v1826_v18   ;;  %v883_v0 = vmul.f32 %v853_v44, %v2469_v2  ;;  %v940_v18 = vadd.f32 %v932_v55, %v844_v9  ;;  %v979_v55 = vmul.f32 %v949_v13, %v2494_v36 }
 0x197   : > { %v891_v44 = vadd.f32 %v883_v0, %v803_v49  ;;  %v846_v49 = vmul.f32 %v825_v28, %v2414_v31 }
 0x199   : > { %1803 = vset.pattern.permute.xlu1 %v3023_v39  ;;  %v997_v53 = vpop.permute.xlu1 %996  ;;  %v987_v59 = vadd.f32 %v979_v55, %v891_v44 }
 0x19a   : > { %1108 = vperm.xlu1 %1803, %v1827_v25   ;;  %v1027_v14 = vmul.f32 %v997_v53, %v2494_v36  ;;  %v804_v53 = vmul.f32 %v2629_v48, %v2400_v33 }
 0x19c   : > { %v1035_v22 = vadd.f32 %v1027_v14, %v939_v3  ;;  %v892_v5 = vadd.f32 %v884_v32, %v804_v53 }
 0x19d   : > { %v1001_v23 = vpop.permute.xlu1 %1000 }
 0x19e   : > { %v1028_v17 = vmul.f32 %v1001_v23, %v2492_v6  ;;  %1804 = vset.pattern.permute.xlu1 %v1982_v30  ;;  %v1828_v23 = vld [vmem:[%s2932_s2 + $0x18] sm:$0xff] }
 0x19f   : > { %1196 = vperm.xlu1 %1804, %v1827_v25  }
 0x1a0   : > { %v1036_v21 = vadd.f32 %v1028_v17, %v940_v18  ;;  %v934_v17 = vmul.f32 %v2638_v38, %v2473_v61  ;;  %v806_v38 = vmul.f32 %v2465_v26, %v2414_v31 }
 0x1a2   : > { %v953_v2 = vpop.permute.xlu1 %952  ;;  %v1638_v34 = vpack.c.bf16 %v1036_v21, %v1035_v22  ;;  %v1029_v21 = vmul.f32 %v2621_v46, %v2498_v27  ;;  %v942_v53 = vadd.f32 %v934_v17, %v846_v49  ;;  %v2719_v17 = vpop.permute.xlu0 %972  ;;  %v1830_v49 = vld [vmem:[%s2932_s2 + $0x28] sm:$0xff] }
 0x1a3   : > { %v980_v9 = vmul.f32 %v953_v2, %v2492_v6  ;;  %1200 = vperm.xlu1 %1804, %v1828_v23  }
 0x1a4   : > { %1639 = vmatprep.subr.bf16.mxu0 %v1638_v34 }
 0x1a5   : > { %v988_v14 = vadd.f32 %v980_v9, %v892_v5 }
 0x1a7   : > { %1805 = vset.pattern.permute.xlu1 %v3024_v12  ;;  %v909_v3 = vpop.permute.xlu1 %908  ;;  %v1640_v48 = vpack.c.bf16 %v988_v14, %v987_v59  ;;  %v982_v59 = vmul.f32 %v961_v20, %v2511_v35  ;;  %v1032_v20 = vmul.f32 %v2627_v10, %v2573_v24  ;;  %v3031_v10 = vld [vmem:[#allocation41_spill] sm:$0xff] }
 0x1a8   : > { %1072 = vperm.xlu1 %1805, %v1828_v23   ;;  %v933_v2 = vmul.f32 %v909_v3, %v2478_v11 }
 0x1a9   : > { %1641 = vmatpush1.bf16.msra.mxu0 %v1640_v48 }
 0x1aa   : > { %v941_v32 = vadd.f32 %v933_v2, %v845_v16 }
 0x1ac   : > { %1806 = vset.pattern.permute.xlu1 %v3025_v56  ;;  %v861_v0 = vpop.permute.xlu1 %860  ;;  %v1037_v5 = vadd.f32 %v1029_v21, %v941_v32  ;;  %v848_v32 = vmul.f32 %v2665_v29, %v2423_v45  ;;  %v3029_v21 = vld [vmem:[#allocation35_spill] sm:$0xff] }
 0x1ad   : > { %1148 = vperm.xlu1 %1806, %v1827_v25   ;;  %v885_v34 = vmul.f32 %v861_v0, %v2478_v11 }
 0x1b0   : > { %v865_v18 = vpop.permute.xlu1 %864 }
 0x1b1   : > { %1807 = vset.pattern.permute.xlu1 %v3026_v51  ;;  %v886_v13 = vmul.f32 %v865_v18, %v2473_v61 }
 0x1b2   : > { %1292 = vperm.xlu1 %1807, %v1827_v25   ;;  %v805_v25 = vmul.f32 %v2632_v57, %v2406_v43  ;;  %v1829_v57 = vld [vmem:[%s2932_s2 + $0x20] sm:$0xff] }
 0x1b3   : > { %v894_v55 = vadd.f32 %v886_v13, %v806_v38  ;;  %v2728_v13 = vpop.permute.xlu0 %1104 }
 0x1b4   : > { %v893_v14 = vadd.f32 %v885_v34, %v805_v25 }
 0x1b5   : > { %v1009_v22 = vpop.permute.xlu1 %1008  ;;  %v990_v26 = vadd.f32 %v982_v59, %v894_v55  ;;  %v887_v59 = vmul.f32 %v2656_v7, %v2483_v50 }
 0x1b6   : > { %v1030_v44 = vmul.f32 %v1009_v22, %v2511_v35  ;;  %1296 = vperm.xlu1 %1807, %v1828_v23  }
 0x1b7   : > { %v2737_v25 = vpop.permute.xlu0 %1112 }
 0x1b8   : > { %v1038_v28 = vadd.f32 %v1030_v44, %v942_v53  ;;  %v3030_v53 = vld [vmem:[#allocation36_spill] sm:$0xff] }
 0x1b9   : > { %v847_v44 = vmul.f32 %v3030_v53, %v3029_v21 }
 0x1ba   : > { %1808 = vset.pattern.permute.xlu1 %v3027_v8  ;;  %v957_v9 = vpop.permute.xlu1 %956  ;;  %v1642_v46 = vpack.c.bf16 %v1038_v28, %v1037_v5 }
 0x1bb   : > { %v981_v3 = vmul.f32 %v957_v9, %v2498_v27  ;;  %1248 = vperm.xlu1 %1808, %v1828_v23  }
 0x1bc   : > { %1643 = vmatprep.subr.bf16.mxu0 %v1642_v46 }
 0x1bd   : > { %v989_v48 = vadd.f32 %v981_v3, %v893_v14  ;;  %v808_v3 = vmul.f32 %v3031_v10, %v2423_v45 }
 0x1bf   : > { %1809 = vset.pattern.permute.xlu1 %v3023_v39  ;;  %v917_v0 = vpop.permute.xlu1 %916  ;;  %v1644_v2 = vpack.c.bf16 %v990_v26, %v989_v48  ;;  %v807_v26 = vmul.f32 %v2636_v15, %v3029_v21 }
 0x1c0   : > { %1116 = vperm.xlu1 %1809, %v1829_v57   ;;  %v935_v22 = vmul.f32 %v917_v0, %v2483_v50  ;;  %v2748_v0 = vpop.permute.xlu0 %1120 }
 0x1c1   : > { %1645 = vmatpush1.bf16.msra.mxu0 %v1644_v2 }
 0x1c2   : > { %v943_v5 = vadd.f32 %v935_v22, %v847_v44 }
 0x1c3   : > { %v921_v18 = vpop.permute.xlu1 %920 }
 0x1c4   : > { %1810 = vset.pattern.permute.xlu1 %v1982_v30  ;;  %v936_v23 = vmul.f32 %v921_v18, %v2480_v42  ;;  %v895_v18 = vadd.f32 %v887_v59, %v807_v26  ;;  %v2752_v44 = vpop.permute.xlu0 %1128 }
 0x1c5   : > { %1204 = vperm.xlu1 %1810, %v1829_v57  }
 0x1c6   : > { %v944_v38 = vadd.f32 %v936_v23, %v848_v32 }
 0x1c8   : > { %v873_v16 = vpop.permute.xlu1 %872  ;;  %v1040_v29 = vadd.f32 %v1032_v20, %v944_v38  ;;  %v2755_v38 = vpop.permute.xlu0 %1060 }
 0x1c9   : > { %1208 = vperm.xlu1 %1810, %v1830_v49   ;;  %v888_v14 = vmul.f32 %v873_v16, %v2480_v42 }
 0x1cb   : > { %v896_v23 = vadd.f32 %v888_v14, %v808_v3 }
 0x1cd   : > { %1811 = vset.pattern.permute.xlu1 %v3024_v12  ;;  %v1013_v34 = vpop.permute.xlu1 %1012 }
 0x1ce   : > { %v1031_v28 = vmul.f32 %v1013_v34, %v2496_v4  ;;  %1080 = vperm.xlu1 %1811, %v1830_v49  }
 0x1d0   : > { %v1039_v55 = vadd.f32 %v1031_v28, %v943_v5  ;;  %v850_v5 = vmul.f32 %v2667_v37, %v3018_v52  ;;  %v2764_v28 = vpop.permute.xlu0 %1068 }
 0x1d2   : > { %1812 = vset.pattern.permute.xlu1 %v3025_v56  ;;  %v965_v9 = vpop.permute.xlu1 %964  ;;  %v1646_v46 = vpack.c.bf16 %v1040_v29, %v1039_v55 }
 0x1d3   : > { %1156 = vperm.xlu1 %1812, %v1829_v57   ;;  %v983_v48 = vmul.f32 %v965_v9, %v2496_v4 }
 0x1d4   : > { %1647 = vmatprep.subr.bf16.mxu0 %v1646_v46  ;;  %v809_v46 = vmul.f32 %v2645_v19, %v2996_v54  ;;  %v2773_v10 = vpop.permute.xlu0 %1076 }
 0x1d5   : > { %v991_v7 = vadd.f32 %v983_v48, %v895_v18  ;;  %v985_v48 = vmul.f32 %v2719_v17, %v2509_v1 }
 0x1d6   : > { %v969_v2 = vpop.permute.xlu1 %968 }
 0x1d7   : > { %v984_v32 = vmul.f32 %v969_v2, %v2573_v24  ;;  %1813 = vset.pattern.permute.xlu1 %v3026_v51 }
 0x1d8   : > { %1300 = vperm.xlu1 %1813, %v1829_v57   ;;  %v1831_v57 = vld [vmem:[%s2932_s2 + $0x30] sm:$0xff] }
 0x1d9   : > { %v992_v16 = vadd.f32 %v984_v32, %v896_v23  ;;  %v2783_v32 = vpop.permute.xlu0 %1084 }
 0x1db   : > { %v929_v22 = vpop.permute.xlu1 %928  ;;  %v1648_v53 = vpack.c.bf16 %v992_v16, %v991_v7 }
 0x1dc   : > { %1304 = vperm.xlu1 %1813, %v1830_v49   ;;  %v938_v20 = vmul.f32 %v929_v22, %v2485_v62 }
 0x1dd   : > { %1649 = vmatpush1.bf16.msra.mxu0 %v1648_v53  ;;  %v1145_v7 = vpop.permute.xlu0 %1144 }
 0x1de   : > { %v946_v9 = vadd.f32 %v938_v20, %v850_v5 }
 0x1e0   : > { %1814 = vset.pattern.permute.xlu1 %v3027_v8  ;;  %v877_v15 = vpop.permute.xlu1 %876 }
 0x1e1   : > { %1256 = vperm.xlu1 %1814, %v1830_v49   ;;  %v889_v49 = vmul.f32 %v877_v15, %v2487_v63  ;;  %v1153_v22 = vpop.permute.xlu0 %1152 }
 0x1e3   : > { %v897_v37 = vadd.f32 %v889_v49, %v809_v46 }
 0x1e5   : > { %1815 = vset.pattern.permute.xlu1 %v3023_v39  ;;  %v1021_v34 = vpop.permute.xlu1 %1020  ;;  %v993_v19 = vadd.f32 %v985_v48, %v897_v37 }
 0x1e6   : > { %1124 = vperm.xlu1 %1815, %v1831_v57   ;;  %v1033_v29 = vmul.f32 %v1021_v34, %v2509_v1 }
 0x1e8   : > { %v1041_v59 = vadd.f32 %v1033_v29, %v2648_v40  ;;  %v1348_v29 = vld [vmem:[#allocation2 + $0x8] sm:$0xff] }
 0x1e9   : > { %v1025_v55 = vpop.permute.xlu1 %1024  ;;  %1615 = vmatprep.mubr.msk.f32.mxu0 %vm252_vm0, %v1348_v29 }
 0x1ea   : > { %v1034_v39 = vmul.f32 %v1025_v55, %v2581_v58  ;;  %1817 = vset.pattern.permute.xlu1 %v1982_v30  ;;  %v1832_v30 = vld [vmem:[%s2932_s2 + $0x38] sm:$0xff] }
 0x1eb   : > { %1212 = vperm.xlu1 %1817, %v1831_v57  }
 0x1ec   : > { %v1042_v14 = vadd.f32 %v1034_v39, %v946_v9 }
 0x1ee   : > { %v977_v3 = vpop.permute.xlu1 %976  ;;  %v1650_v26 = vpack.c.bf16 %v1042_v14, %v1041_v59  ;;  %v1091_v59 = vmul.f32 %v2755_v38, %v2402_v41 }
 0x1ef   : > { %v986_v2 = vmul.f32 %v977_v3, %v2581_v58  ;;  %1216 = vperm.xlu1 %1817, %v1832_v30  }
 0x1f0   : > { %1651 = vmatprep.subr.bf16.mxu0 %v1650_v26  ;;  %v1172_v26 = vmul.f32 %v1145_v7, %v2471_v60 }
 0x1f1   : > { %v994_v40 = vadd.f32 %v986_v2, %v2662_v47  ;;  %v2787_v47 = vpop.permute.xlu0 %1160 }
 0x1f3   : > { %1819 = vset.pattern.permute.xlu1 %v3024_v12  ;;  %v1101_v18 = vpop.permute.xlu1 %1100  ;;  %v1652_v23 = vpack.c.bf16 %v994_v40, %v993_v19 }
 0x1f4   : > { %1088 = vperm.xlu1 %1819, %v1832_v30  }
 0x1f5   : > { %1653 = vmatpush1.bf16.msra.mxu0 %v1652_v23  ;;  %v2790_v34 = vpop.permute.xlu0 %1168 }
 0x1f8   : > { %1820 = vset.pattern.permute.xlu1 %v3025_v56  ;;  %v1189_v17 = vpop.permute.xlu1 %1188  ;;  %v3032_v56 = vld [vmem:[#allocation40_spill] sm:$0xff] }
 0x1f9   : > { %1164 = vperm.xlu1 %1820, %v1831_v57   ;;  %v1219_v20 = vmul.f32 %v1189_v17, %v3032_v56  ;;  %v1237_v37 = vpop.permute.xlu0 %1236 }
 0x1fa   : > { %v1267_v19 = vmul.f32 %v1237_v37, %v2494_v36 }
 0x1fc   : > { %v1193_v16 = vpop.permute.xlu1 %1192 }
 0x1fd   : > { %1822 = vset.pattern.permute.xlu1 %v3026_v51  ;;  %v1220_v5 = vmul.f32 %v1193_v16, %v2471_v60  ;;  %v1132_v51 = vmul.f32 %v2728_v13, %v2400_v33 }
 0x1fe   : > { %1308 = vperm.xlu1 %1822, %v1831_v57   ;;  %v1131_v57 = vmul.f32 %v1101_v18, %v2402_v41 }
 0x1ff   : > { %v1228_v39 = vadd.f32 %v1220_v5, %v1132_v51 }
 0x200   : > { %v1227_v9 = vadd.f32 %v1219_v20, %v1131_v57 }
 0x201   : > { %v1065_v53 = vpop.permute.xlu1 %1064 }
 0x202   : > { %1312 = vperm.xlu1 %1822, %v1832_v30   ;;  %v1092_v14 = vmul.f32 %v1065_v53, %v2400_v33 }
 0x204   : > { %v1180_v40 = vadd.f32 %v1172_v26, %v1092_v14 }
 0x206   : > { %1823 = vset.pattern.permute.xlu1 %v3027_v8  ;;  %v1141_v12 = vpop.permute.xlu1 %1140 }
 0x207   : > { %1264 = vperm.xlu1 %1823, %v1832_v30   ;;  %v1171_v8 = vmul.f32 %v1141_v12, %v3032_v56 }
 0x209   : > { %v1179_v48 = vadd.f32 %v1171_v8, %v1091_v59 }
 0x20b   : > { %v1285_v15 = vpop.permute.xlu1 %1284  ;;  %v1275_v23 = vadd.f32 %v1267_v19, %v1179_v48 }
 0x20c   : > { %v1315_v49 = vmul.f32 %v1285_v15, %v2494_v36  ;;  %v1134_v36 = vmul.f32 %v2737_v25, %v2414_v31  ;;  %v1174_v25 = vmul.f32 %v1153_v22, %v2473_v61 }
 0x20e   : > { %v1323_v13 = vadd.f32 %v1315_v49, %v1227_v9  ;;  %v1093_v49 = vmul.f32 %v2764_v28, %v2406_v43 }
 0x20f   : > { %v1289_v55 = vpop.permute.xlu1 %1288 }
 0x210   : > { %v1316_v46 = vmul.f32 %v1289_v55, %v2492_v6  ;;  %v1245_v55 = vpop.permute.xlu0 %1244 }
 0x212   : > { %v1324_v3 = vadd.f32 %v1316_v46, %v1228_v39 }
 0x214   : > { %v1241_v2 = vpop.permute.xlu1 %1240  ;;  %v1654_v30 = vpack.c.bf16 %v1324_v3, %v1323_v13 }
 0x215   : > { %v1268_v18 = vmul.f32 %v1241_v2, %v2492_v6 }
 0x216   : > { %1655 = vmatprep.subr.bf16.mxu0 %v1654_v30 }
 0x217   : > { %v1276_v17 = vadd.f32 %v1268_v18, %v1180_v40 }
 0x219   : > { %v1109_v16 = vpop.permute.xlu1 %1108  ;;  %v1656_v41 = vpack.c.bf16 %v1276_v17, %v1275_v23 }
 0x21a   : > { %v1133_v6 = vmul.f32 %v1109_v16, %v2406_v43 }
 0x21b   : > { %1657 = vmatpush1.bf16.msra.mxu0 %v1656_v41 }
 0x21e   : > { %v1197_v33 = vpop.permute.xlu1 %1196 }
 0x21f   : > { %v1221_v60 = vmul.f32 %v1197_v33, %v2478_v11  ;;  %v1095_v33 = vmul.f32 %v2773_v10, %v3029_v21 }
 0x221   : > { %v1229_v29 = vadd.f32 %v1221_v60, %v1133_v6 }
 0x222   : > { %v1201_v38 = vpop.permute.xlu1 %1200 }
 0x223   : > { %v1222_v7 = vmul.f32 %v1201_v38, %v2473_v61 }
 0x225   : > { %v1230_v51 = vadd.f32 %v1222_v7, %v1134_v36 }
 0x227   : > { %v1073_v53 = vpop.permute.xlu1 %1072 }
 0x228   : > { %v1094_v8 = vmul.f32 %v1073_v53, %v2414_v31  ;;  %v1253_v53 = vpop.permute.xlu0 %1252 }
 0x22a   : > { %v1182_v37 = vadd.f32 %v1174_v25, %v1094_v8 }
 0x22c   : > { %v1149_v12 = vpop.permute.xlu1 %1148 }
 0x22d   : > { %v1173_v20 = vmul.f32 %v1149_v12, %v2478_v11  ;;  %v1269_v11 = vmul.f32 %v1245_v55, %v2498_v27 }
 0x22f   : > { %v1181_v46 = vadd.f32 %v1173_v20, %v1093_v49 }
 0x231   : > { %v1293_v15 = vpop.permute.xlu1 %1292  ;;  %v1277_v3 = vadd.f32 %v1269_v11, %v1181_v46  ;;  %v1261_v11 = vpop.permute.xlu0 %1260 }
 0x232   : > { %v1317_v56 = vmul.f32 %v1293_v15, %v2498_v27  ;;  %v1136_v27 = vmul.f32 %v2748_v0, %v2423_v45  ;;  %v1176_v0 = vmul.f32 %v2787_v47, %v2480_v42 }
 0x234   : > { %v1325_v9 = vadd.f32 %v1317_v56, %v1229_v29 }
 0x235   : > { %v1297_v5 = vpop.permute.xlu1 %1296 }
 0x236   : > { %v1318_v57 = vmul.f32 %v1297_v5, %v2511_v35 }
 0x238   : > { %v1326_v39 = vadd.f32 %v1318_v57, %v1230_v51 }
 0x23a   : > { %v1249_v59 = vpop.permute.xlu1 %1248  ;;  %v1658_v14 = vpack.c.bf16 %v1326_v39, %v1325_v9 }
 0x23b   : > { %v1270_v13 = vmul.f32 %v1249_v59, %v2511_v35  ;;  %v1097_v59 = vmul.f32 %v2783_v32, %v2996_v54 }
 0x23c   : > { %1659 = vmatprep.subr.bf16.mxu0 %v1658_v14 }
 0x23d   : > { %v1278_v26 = vadd.f32 %v1270_v13, %v1182_v37  ;;  %v1178_v13 = vmul.f32 %v2790_v34, %v2485_v62 }
 0x23f   : > { %v1117_v48 = vpop.permute.xlu1 %1116  ;;  %v1660_v43 = vpack.c.bf16 %v1278_v26, %v1277_v3 }
 0x240   : > { %v1135_v35 = vmul.f32 %v1117_v48, %v3029_v21  ;;  %v1273_v48 = vmul.f32 %v1261_v11, %v2509_v1 }
 0x241   : > { %1661 = vmatpush1.bf16.msra.mxu0 %v1660_v43 }
 0x244   : > { %v1205_v31 = vpop.permute.xlu1 %1204 }
 0x245   : > { %v1223_v61 = vmul.f32 %v1205_v31, %v2483_v50 }
 0x247   : > { %v1231_v17 = vadd.f32 %v1223_v61, %v1135_v35 }
 0x248   : > { %v1209_v28 = vpop.permute.xlu1 %1208 }
 0x249   : > { %v1224_v22 = vmul.f32 %v1209_v28, %v2480_v42  ;;  %v1347_v28 = vld [vmem:[#allocation2] sm:$0xff] }
 0x24b   : > { %v1232_v16 = vadd.f32 %v1224_v22, %v1136_v27 }
 0x24d   : > { %v1081_v2 = vpop.permute.xlu1 %1080 }
 0x24e   : > { %v1096_v38 = vmul.f32 %v1081_v2, %v2423_v45  ;;  %v1471_v2 = vld [vmem:[%s2072_s10] sm:$0xff] }
 0x250   : > { %v1184_v6 = vadd.f32 %v1176_v0, %v1096_v38 }
 0x252   : > { %v1157_v30 = vpop.permute.xlu1 %1156 }
 0x253   : > { %v1175_v18 = vmul.f32 %v1157_v30, %v2483_v50  ;;  %v1271_v50 = vmul.f32 %v1253_v53, %v2496_v4  ;;  %v1474_v30 = vld [vmem:[%s2075_s11] sm:$0xff] }
 0x255   : > { %v1183_v60 = vadd.f32 %v1175_v18, %v1095_v33 }
 0x257   : > { %v1301_v19 = vpop.permute.xlu1 %1300  ;;  %v1279_v20 = vadd.f32 %v1271_v50, %v1183_v60 }
 0x258   : > { %v1319_v40 = vmul.f32 %v1301_v19, %v2496_v4  ;;  %v1138_v4 = vmul.f32 %v2752_v44, %v3018_v52 }
 0x25a   : > { %v1327_v12 = vadd.f32 %v1319_v40, %v1231_v17 }
 0x25b   : > { %v1305_v23 = vpop.permute.xlu1 %1304 }
 0x25c   : > { %v1320_v41 = vmul.f32 %v1305_v23, %v2573_v24 }
 0x25e   : > { %v1328_v15 = vadd.f32 %v1320_v41, %v1232_v16 }
 0x260   : > { %v1257_v7 = vpop.permute.xlu1 %1256  ;;  %v1662_v36 = vpack.c.bf16 %v1328_v15, %v1327_v12 }
 0x261   : > { %v1272_v56 = vmul.f32 %v1257_v7, %v2573_v24 }
 0x262   : > { %1663 = vmatprep.subr.bf16.mxu0 %v1662_v36 }
 0x263   : > { %v1280_v5 = vadd.f32 %v1272_v56, %v1184_v6 }
 0x265   : > { %v1125_v21 = vpop.permute.xlu1 %1124  ;;  %v1664_v10 = vpack.c.bf16 %v1280_v5, %v1279_v20 }
 0x266   : > { %v1137_v24 = vmul.f32 %v1125_v21, %v2996_v54 }
 0x267   : > { %1665 = vmatpush1.bf16.msra.mxu0 %v1664_v10 }
 0x26a   : > { %v1213_v45 = vpop.permute.xlu1 %1212 }
 0x26b   : > { %v1225_v42 = vmul.f32 %v1213_v45, %v2487_v63 }
 0x26d   : > { %v1233_v39 = vadd.f32 %v1225_v42, %v1137_v24 }
 0x26e   : > { %v1217_v29 = vpop.permute.xlu1 %1216 }
 0x26f   : > { %v1226_v47 = vmul.f32 %v1217_v29, %v2485_v62 }
 0x271   : > { %v1234_v25 = vadd.f32 %v1226_v47, %v1138_v4 }
 0x273   : > { %v1089_v51 = vpop.permute.xlu1 %1088 }
 0x274   : > { %v1098_v14 = vmul.f32 %v1089_v51, %v3018_v52 }
 0x276   : > { %v1186_v43 = vadd.f32 %v1178_v13, %v1098_v14 }
 0x278   : > { %v1165_v57 = vpop.permute.xlu1 %1164 }
 0x279   : > { %v1177_v55 = vmul.f32 %v1165_v57, %v2487_v63 }
 0x27b   : > { %v1185_v3 = vadd.f32 %v1177_v55, %v1097_v59 }
 0x27d   : > { %v1309_v49 = vpop.permute.xlu1 %1308  ;;  %v1281_v52 = vadd.f32 %v1273_v48, %v1185_v3 }
 0x27e   : > { %v1321_v8 = vmul.f32 %v1309_v49, %v2509_v1 }
 0x280   : > { %v1329_v37 = vadd.f32 %v1321_v8, %v1233_v39 }
 0x281   : > { %v1313_v9 = vpop.permute.xlu1 %1312 }
 0x282   : > { %v1322_v46 = vmul.f32 %v1313_v9, %v2581_v58 }
 0x284   : > { %v1330_v44 = vadd.f32 %v1322_v46, %v1234_v25 }
 0x286   : > { %v1265_v63 = vpop.permute.xlu1 %1264  ;;  %v1666_v26 = vpack.c.bf16 %v1330_v44, %v1329_v37 }
 0x287   : > { %v1274_v54 = vmul.f32 %v1265_v63, %v2581_v58 }
 0x288   : > { %1667 = vmatprep.subr.bf16.mxu0 %v1666_v26 }
 0x289   : > { %v1282_v32 = vadd.f32 %v1274_v54, %v1186_v43 }
 0x28b   : > { %v1668_v31 = vpack.c.bf16 %v1282_v32, %v1281_v52 }
 0x28d   : > { %1669 = vmatpush1.bf16.msra.mxu0 %v1668_v31 }
 0x290   : > { %1465 = vmatmul.mubr.f32.vlgmr.msra.gmra.mrb[0].mxu0 %v1347_v28 }
 0x363   : > { %v1466_v62 = vpop.f32.mrb[0].mxu0 }
 0x364   : > { %v1472_v34 = vadd.f32 %v1471_v2, %v1466_v62  ;;  %v1468_v19 = vpop.f32.mrb[1].mxu0 }
 0x365   : > { %v1475_v61 = vadd.f32 %v1474_v30, %v1468_v19 }
 0x366   : > { %1473 = vst [vmem:[%s2072_s10] sm:$0xff] %v1472_v34 }
 0x367   : > { %1476 = vst [vmem:[%s2075_s11] sm:$0xff] %v1475_v61 }
 0x368 PF: > { %s1618_s9 = sshll.u32 %s1949_s22, 7  ;;  %s1497_s15 = sshll.u32 %s2072_s10, 4  ;;  %s1498_s15 = int_to_ptr.vmem [resolvable:$true] %s1497_s15 }
 0x369   : > { %s2861_s14 = scalar_lea.hbm %s2933_s3, %s1618_s9  ;;  %s1478_s16 = scalar_lea.sflag [#allocation7], %s2069_s7 }
 0x36a   : > { %s1845_s17 = scalar_lea.vmem %s1498_s15, 128  ;;  %s1983_s18 = smov [#allocation6]  }
 0x36b   : > { %p1846_p12 = scmp.ne.s32.totalorder %s1498_s15, %s1845_s17  ;;  %s1849_s19 = sshll.u32 %s1983_s18, 4  ;;  %s1850_s19 = int_to_ptr.vmem [resolvable:$false] %s1849_s19 }
 0x36c   : > { %s1851_s25 = scalar_lea.vmem %s1850_s19, 256  ;;  %p1852_p2 = scmp.lt.s32.totalorder %s1498_s15, %s1850_s19 }
 0x36d   : > { %p1847_p0 = pnand %p1846_p12, %p2053_p9  ;;  %p1853_p3 = scmp.lt.s32.totalorder %s1851_s25, %s1845_s17 }
 0x36f   : > { %p1848_p1 = pneg %p1847_p0  ;;  %p1854_p4 = por %p1853_p3, %p1852_p2 }
 0x371   : > { %p1855_p5 = pnand %p1854_p4, %p1848_p1 }
 0x373   : > { %1858 = shalt.err (!%p1855_p5)
}
 0x374   : > { %s1859_s10 = scalar_lea.hbm %s2861_s14, 128  ;;  %s1863_s30 = scalar_lea.hbm %s2933_s3, 256 }
 0x375   : > { %p1860_p6 = scmp.ne.s32.totalorder %s2861_s14, %s1859_s10  ;;  %p1864_p10 = scmp.lt.u32.totalorder %s2861_s14, %s2933_s3 }
 0x376   : > { %p1865_p11 = scmp.lt.u32.totalorder %s1863_s30, %s1859_s10  ;;  %p1867_p0 = scmp.lt.u32.totalorder %s1859_s10, %s2861_s14 }
 0x377   : > { %p1861_p7 = pnand %p1860_p6, %p2053_p9 }
 0x378   : > { %p1866_p12 = por %p1865_p11, %p1864_p10 }
 0x379   : > { %p1862_p8 = pneg %p1861_p7 }
 0x37a   : > { %p1868_p1 = por %p1867_p0, %p1866_p12 }
 0x37c   : > { %p1869_p2 = pnand %p1868_p1, %p1862_p8 }
 0x37e   : > { %1872 = shalt.err (!%p1869_p2)
}
 0x37f   : > { %1670 = dma.vmem_to_hbm [thread:$0]  (%p2053_p9), %s1498_s15, 128, %s2861_s14, %s1478_s16  }
 0x380   : > { %s2887_s18 = scalar_lea.hbm %s2934_s4, %s1618_s9  ;;  %s1511_s19 = sshll.u32 %s2075_s11, 4  ;;  %s1512_s19 = int_to_ptr.vmem [resolvable:$true] %s1511_s19 }
 0x381   : > { %s1483_s25 = scalar_lea.sflag [#allocation9], %s2069_s7  ;;  %s1873_s10 = scalar_lea.vmem %s1512_s19, 128 }
 0x382   : > { %p1874_p3 = scmp.ne.s32.totalorder %s1512_s19, %s1873_s10  ;;  %s1984_s26 = smov [#allocation8]  }
 0x383   : > { %s1877_s28 = sshll.u32 %s1984_s26, 4  ;;  %s1878_s28 = int_to_ptr.vmem [resolvable:$false] %s1877_s28 }
 0x384   : > { %p1875_p4 = pnand %p1874_p3, %p2053_p9  ;;  %s1879_s30 = scalar_lea.vmem %s1878_s28, 256 }
 0x385   : > { %p1880_p6 = scmp.lt.s32.totalorder %s1512_s19, %s1878_s28  ;;  %p1881_p7 = scmp.lt.s32.totalorder %s1879_s30, %s1873_s10 }
 0x386   : > { %p1876_p5 = pneg %p1875_p4 }
 0x387   : > { %p1882_p8 = por %p1881_p7, %p1880_p6 }
 0x389   : > { %p1883_p10 = pnand %p1882_p8, %p1876_p5 }
 0x38b   : > { %1886 = shalt.err (!%p1883_p10)
}
 0x38c   : > { %s1887_s22 = scalar_lea.hbm %s2887_s18, 128  ;;  %s1891_s9 = scalar_lea.hbm %s2934_s4, 256 }
 0x38d   : > { %p1888_p11 = scmp.ne.s32.totalorder %s2887_s18, %s1887_s22  ;;  %p1892_p1 = scmp.lt.u32.totalorder %s2887_s18, %s2934_s4 }
 0x38e   : > { %p1893_p2 = scmp.lt.u32.totalorder %s1891_s9, %s1887_s22  ;;  %p1895_p4 = scmp.lt.u32.totalorder %s1887_s22, %s2887_s18 }
 0x38f   : > { %p1889_p12 = pnand %p1888_p11, %p2053_p9 }
 0x390   : > { %p1894_p3 = por %p1893_p2, %p1892_p1 }
 0x391   : > { %p1890_p0 = pneg %p1889_p12 }
 0x392   : > { %p1896_p5 = por %p1895_p4, %p1894_p3 }
 0x394   : > { %p1897_p6 = pnand %p1896_p5, %p1890_p0 }
 0x396   : > { %1900 = shalt.err (!%p1897_p6)
}
 0x397   : > { %1671 = dma.vmem_to_hbm [thread:$0]  (%p2053_p9), %s1512_s19, 128, %s2887_s18, %s1483_s25  }
 0x398 PF: > { %p1681_p7 = scmp.ge.s32.totalorder %s1957_s24, 2  ;;  %s1523_s16 = sand.u32 1, %s1937_s20  }
 0x399   : > { %s1524_s8 = scalar_lea.sflag [#allocation7], %s1523_s16 }
 0x39a   : > { %p1675_p8 = pnand %p1681_p7, %p2060_p13 }
 0x39c   : > { %1928 = dma.done.wait (!%p1675_p8), %s1524_s8, 128  }
 0x39d   : > { %1930 = vsyncadd (!%p1675_p8), %s1524_s8, 4294967168  ;;  %s1533_s12 = scalar_lea.sflag [#allocation9], %s1523_s16 }
 0x39e   : > { %1932 = dma.done.wait (!%p1675_p8), %s1533_s12, 128  }
 0x39f   : > { %1934 = vsyncadd (!%p1675_p8), %s1533_s12, 4294967168  ;;  %s27_s24 = sadd.s32 1, %s1957_s24   ;;  %s3033_s20 = smov %s1941_s0 }
 0x3a0   : > { %p24_p10 = scmp.ge.s32.totalorder %s27_s24, 4   ;;  %s3034_s0 = smov %s1945_s21 }
 0x3a1   : > { %s3035_s21 = smov %s2066_s6  ;;  %s3036_s22 = smov %s1953_s23 }
 0x3a2   : > { %s3037_s23 = smov %s3039_s27  ;;  %26 = sbr.rel (!%p24_p10) target bundleno = 21 (0x15), region = 85 }
 0x3a9   :  { %1538 = vsyncpa [#allocation7], 1 }
 0x3aa   :  { %1540 = vsyncpa [#allocation7 + $0x1], 1 }
 0x3ab   :  { %1541 = vsyncpa [#allocation9], 1 }
 0x3ac   :  { %1543 = vsyncpa [#allocation9 + $0x1], 1 }

</bundles_post_ra>
